<compile_context>
chip_gen: v6e
topology: v6e:2x2x1
jax: 0.10.0
libtpu: 0.0.40
codegen_flags: <defaults>
</compile_context>

<pallas_src>
import math
import functools

import jax
import jax.numpy as jnp
from jax.experimental import pallas as pl
from jax.experimental.pallas import tpu as pltpu

# -------- model hyper-parameters (small, consistent with the module) --------
D_MODEL = 32
NHEAD = 4
HEAD_DIM = D_MODEL // NHEAD
DIM_FF = 64
NUM_LAYERS = 2
SEQ = 8
BATCH = 2
LN_EPS = 1e-5

LANE = 128                 # lane width of packed parameter slabs
ROWS = SEQ * BATCH         # token rows processed at once (row = s * BATCH + b)

# row offsets inside the packed vector-parameter slab (per layer)
ROW_BQKV = 0               # fused q|k|v bias (Q part pre-scaled), 96 cols used
ROW_BO = 1
ROW_LN1G = 2
ROW_LN1B = 3
ROW_B1 = 4
ROW_B2 = 5
ROW_LN2G = 6
ROW_LN2B = 7
VROWS_PER_LAYER = 8


# ----------------------------- shared helpers --------------------------------
def _layernorm(x, g, b):
    mu = jnp.mean(x, axis=-1, keepdims=True)
    d = x - mu
    var = jnp.mean(d * d, axis=-1, keepdims=True)
    return d * jax.lax.rsqrt(var + LN_EPS) * g + b


# ------------------------------- fused kernel --------------------------------
def encoder_stack_kernel(x_ref, wqkv_ref, wo_ref, w1_ref, w2_ref, vec_ref,
                         y_ref, attn_ref, ctx_ref, *, apply_final_norm):
    """Whole encoder stack on one (ROWS, E) activation block.

    x_ref   : (ROWS, E)                     seq-major rows (row = s*B + b)
    wqkv_ref: (L, E, 128)                   fused Q|K|V weights (Q pre-scaled),
                                            cols 96..127 are zero padding
    wo_ref  : (L, E, E)                     out-projection weights
    w1_ref  : (E, L*DIM_FF)                 both layers' W1, lane-dense (32,128)
    w2_ref  : (L, DIM_FF, E)
    vec_ref : (rows, 128)                   packed biases / LayerNorm params
    y_ref   : (ROWS, E)
    attn_ref: (L, ROWS, ROWS)               head-averaged attn (cross-batch = 0)
    ctx_ref : (ROWS, E)  VMEM scratch       per-head contexts assembled here
    """
    x = x_ref[...]                                               # (ROWS, E)

    # additive block mask that keeps attention within each batch element
    ri = jax.lax.broadcasted_iota(jnp.int32, (ROWS, ROWS), 0)
    ci = jax.lax.broadcasted_iota(jnp.int32, (ROWS, ROWS), 1)
    mask_add = jnp.where((ri % BATCH) == (ci % BATCH), 0.0, -1e30)

    for l in range(NUM_LAYERS):                                  # static unroll
        base = l * VROWS_PER_LAYER

        # ---- fused QKV projection: one lane-dense matmul per layer ----
        qkv = (jnp.dot(x, wqkv_ref[l], preferred_element_type=jnp.float32)
               + vec_ref[base + ROW_BQKV:base + ROW_BQKV + 1, :])  # (ROWS, 128)

        p_acc = jnp.zeros((ROWS, ROWS), jnp.float32)
        for h in range(NHEAD):                                   # static unroll
            c = h * HEAD_DIM
            qh = qkv[:, c:c + HEAD_DIM]                          # pre-scaled
            kh = qkv[:, D_MODEL + c:D_MODEL + c + HEAD_DIM]
            vh = qkv[:, 2 * D_MODEL + c:2 * D_MODEL + c + HEAD_DIM]

            s = jax.lax.dot_general(qh, kh, (((1,), (1,)), ((), ())),
                                    preferred_element_type=jnp.float32)
            s = s + mask_add
            s = s - jnp.max(s, axis=-1, keepdims=True)
            e = jnp.exp(s)                      # off-block underflows to +0.0
            p = e * pl.reciprocal(jnp.sum(e, axis=-1, keepdims=True),
                                  approx=True)                   # EUP, not VALU
            p_acc = p_acc + p

            # assemble all-head context at static lane offsets
            ctx_ref[:, c:c + HEAD_DIM] = jnp.dot(
                p, vh, preferred_element_type=jnp.float32)

        attn_ref[l] = p_acc * (1.0 / NHEAD)                      # head average

        # ---- fused output projection: one (ROWS,E) @ (E,E) matmul ----
        attn_out = (jnp.dot(ctx_ref[...], wo_ref[l],
                            preferred_element_type=jnp.float32)
                    + vec_ref[base + ROW_BO:base + ROW_BO + 1, :D_MODEL])

        x = _layernorm(x + attn_out,
                       vec_ref[base + ROW_LN1G:base + ROW_LN1G + 1, :D_MODEL],
                       vec_ref[base + ROW_LN1B:base + ROW_LN1B + 1, :D_MODEL])

        # ---- feed-forward ----
        w1 = w1_ref[:, l * DIM_FF:(l + 1) * DIM_FF]              # static slice
        h1 = jnp.maximum(
            jnp.dot(x, w1, preferred_element_type=jnp.float32)
            + vec_ref[base + ROW_B1:base + ROW_B1 + 1, :DIM_FF], 0.0)
        ff = (jnp.dot(h1, w2_ref[l], preferred_element_type=jnp.float32)
              + vec_ref[base + ROW_B2:base + ROW_B2 + 1, :D_MODEL])
        x = _layernorm(x + ff,
                       vec_ref[base + ROW_LN2G:base + ROW_LN2G + 1, :D_MODEL],
                       vec_ref[base + ROW_LN2B:base + ROW_LN2B + 1, :D_MODEL])

    if apply_final_norm:
        fb = NUM_LAYERS * VROWS_PER_LAYER
        x = _layernorm(x, vec_ref[fb:fb + 1, :D_MODEL],
                       vec_ref[fb + 1:fb + 2, :D_MODEL])

    y_ref[...] = x


# --------------------------- host-side weight packing -------------------------
def _pad_row(v):
    v = jnp.asarray(v, jnp.float32).reshape(-1)
    return jnp.pad(v, (0, LANE - v.shape[0]))


def pack_params(layer_params, norm_params):
    """Repack per-layer torch-style params into lane-dense slabs."""
    scale = 1.0 / math.sqrt(HEAD_DIM)
    wqkv_all, wo_all, w1_cols, w2_all, vec_rows = [], [], [], [], []
    for (wqkv, bqkv, wo, bo, ln1g, ln1b, w1, b1, w2, b2, ln2g, ln2b) in layer_params:
        # fused Q|K|V weights, Q columns pre-scaled, zero-padded to 128 lanes
        w = wqkv.at[:, :D_MODEL].multiply(scale)                 # (E, 3E)
        wqkv_all.append(jnp.pad(w, ((0, 0), (0, LANE - 3 * D_MODEL))))
        wo_all.append(wo)                                        # (E, E)
        w1_cols.append(w1)                                       # (E, DIM_FF)
        w2_all.append(w2)                                        # (DIM_FF, E)
        # bias / LN rows (order must match the ROW_* constants)
        bq = bqkv[0].at[:D_MODEL].multiply(scale)                # (3E,)
        vec_rows.append(_pad_row(bq))
        for r in (bo[0], ln1g[0], ln1b[0], b1[0], b2[0], ln2g[0], ln2b[0]):
            vec_rows.append(_pad_row(r))
    if norm_params is not None:
        vec_rows.append(_pad_row(norm_params[0][0]))
        vec_rows.append(_pad_row(norm_params[1][0]))
    return (jnp.stack(wqkv_all),                # (L, E, 128)
            jnp.stack(wo_all),                  # (L, E, E)
            jnp.concatenate(w1_cols, axis=1),   # (E, L*DIM_FF) = (32, 128)
            jnp.stack(w2_all),                  # (L, DIM_FF, E)
            jnp.stack(vec_rows))                # (rows, 128)


# ------------------------------- public wrapper --------------------------------
def transformer_encoder(src, layer_params, norm_params):
    """src: (S, B, E) seq-first.  Returns (output (S,B,E), attns (L,B,S,S))."""
    S, B, E = src.shape
    assert (S, B, E) == (SEQ, BATCH, D_MODEL)
    packed = pack_params(layer_params, norm_params)
    kern = functools.partial(encoder_stack_kernel,
                             apply_final_norm=norm_params is not None)

    x2d = src.reshape(S * B, E)                      # free contiguous reshape
    y2d, attn_raw = pl.pallas_call(
        kern,
        out_shape=(jax.ShapeDtypeStruct((S * B, E), jnp.float32),
                   jax.ShapeDtypeStruct((NUM_LAYERS, S * B, S * B), jnp.float32)),
        scratch_shapes=[pltpu.VMEM((S * B, E), jnp.float32)],
    )(x2d, *packed)

    out = y2d.reshape(S, B, E)
    # cross-batch attn entries are exactly zero -> recover per-batch (S,S) blocks
    attn = attn_raw.reshape(NUM_LAYERS, S, B, S, B).sum(axis=4)   # (L, S, B, S)
    attn = jnp.transpose(attn, (0, 2, 1, 3))                       # (L, B, S, S)
    return out, attn


# --------------------------- parameter construction ---------------------------
def init_layer_params(key):
    ks = jax.random.split(key, 8)
    scale = 0.05
    wqkv = jax.random.normal(ks[0], (D_MODEL, 3 * D_MODEL), jnp.float32) * scale
    bqkv = jax.random.normal(ks[1], (1, 3 * D_MODEL), jnp.float32) * scale
    wo = jax.random.normal(ks[2], (D_MODEL, D_MODEL), jnp.float32) * scale
    bo = jax.random.normal(ks[3], (1, D_MODEL), jnp.float32) * scale
    ln1g = jnp.ones((1, D_MODEL), jnp.float32)
    ln1b = jnp.zeros((1, D_MODEL), jnp.float32)
    w1 = jax.random.normal(ks[4], (D_MODEL, DIM_FF), jnp.float32) * scale
    b1 = jax.random.normal(ks[5], (1, DIM_FF), jnp.float32) * scale
    w2 = jax.random.normal(ks[6], (DIM_FF, D_MODEL), jnp.float32) * scale
    b2 = jax.random.normal(ks[7], (1, D_MODEL), jnp.float32) * scale
    ln2g = jnp.ones((1, D_MODEL), jnp.float32)
    ln2b = jnp.zeros((1, D_MODEL), jnp.float32)
    return (wqkv, bqkv, wo, bo, ln1g, ln1b, w1, b1, w2, b2, ln2g, ln2b)


# ----------------------------- pure-JAX reference ------------------------------
def _ref_layer(x, params):
    (wqkv, bqkv, wo, bo, ln1g, ln1b, w1, b1, w2, b2, ln2g, ln2b) = params
    qkv = x @ wqkv + bqkv[0]
    q, k, v = qkv[..., :D_MODEL], qkv[..., D_MODEL:2 * D_MODEL], qkv[..., 2 * D_MODEL:]
    B, S, _ = x.shape
    qh = q.reshape(B, S, NHEAD, HEAD_DIM).transpose(0, 2, 1, 3) / math.sqrt(HEAD_DIM)
    kh = k.reshape(B, S, NHEAD, HEAD_DIM).transpose(0, 2, 1, 3)
    vh = v.reshape(B, S, NHEAD, HEAD_DIM).transpose(0, 2, 1, 3)
    s = jnp.einsum("bhqd,bhkd->bhqk", qh, kh)
    p = jax.nn.softmax(s, axis=-1)
    ctx = jnp.einsum("bhqk,bhkd->bhqd", p, vh).transpose(0, 2, 1, 3).reshape(B, S, D_MODEL)
    attn_out = ctx @ wo + bo[0]
    x1 = _layernorm(x + attn_out, ln1g[0], ln1b[0])
    ff = jnp.maximum(x1 @ w1 + b1[0], 0.0) @ w2 + b2[0]
    x2 = _layernorm(x1 + ff, ln2g[0], ln2b[0])
    return x2, jnp.mean(p, axis=1)


def _ref_encoder(src, layer_params, norm_params):
    x = jnp.transpose(src, (1, 0, 2))
    attns = []
    for params in layer_params:
        x, a = _ref_layer(x, params)
        attns.append(a)
    attns = jnp.stack(attns)
    if norm_params is not None:
        x = _layernorm(x, norm_params[0][0], norm_params[1][0])
    return jnp.transpose(x, (1, 0, 2)), attns


# ------------------------------------ main -------------------------------------
if __name__ == "__main__":
    key = jax.random.PRNGKey(0)
    k_src, k_layers, _ = jax.random.split(key, 3)

    src = jax.random.normal(k_src, (SEQ, BATCH, D_MODEL), jnp.float32)  # (S, B, E)

    layer_keys = jax.random.split(k_layers, NUM_LAYERS)
    layer_params = [init_layer_params(k) for k in layer_keys]
    # optional final norm of the TransformerEncoder (norm=LayerNorm(d_model))
    norm_params = (jnp.ones((1, D_MODEL), jnp.float32),
                   jnp.zeros((1, D_MODEL), jnp.float32))

    fwd = jax.jit(transformer_encoder)
    out, attns = fwd(src, layer_params, norm_params)
    out = jax.block_until_ready(out)
    attns = jax.block_until_ready(attns)

    # sanity check against a pure-JAX reference
    ref_out, ref_attns = _ref_encoder(src, layer_params, norm_params)
    assert out.shape == (SEQ, BATCH, D_MODEL)
    assert attns.shape == (NUM_LAYERS, BATCH, SEQ, SEQ)
    assert jnp.allclose(out, ref_out, atol=2e-3, rtol=2e-3)
    assert jnp.allclose(attns, ref_attns, atol=2e-3, rtol=2e-3)

    # TODO(synk): src_mask / src_key_padding_mask and dropout are not implemented
    # (forward matches PyTorch eval mode with both masks = None).
    print("KERNEL_OK")
</pallas_src>

<mosaic_0001>
module attributes {stable_mosaic.version = 11 : i64} {
  func.func @encoder_stack_kernel(%arg0: memref<16x32xf32, #tpu.memory_space<vmem>>, %arg1: memref<2x32x128xf32, #tpu.memory_space<vmem>>, %arg2: memref<2x32x32xf32, #tpu.memory_space<vmem>>, %arg3: memref<32x128xf32, #tpu.memory_space<vmem>>, %arg4: memref<2x64x32xf32, #tpu.memory_space<vmem>>, %arg5: memref<18x128xf32, #tpu.memory_space<vmem>>, %arg6: memref<16x32xf32, #tpu.memory_space<vmem>>, %arg7: memref<2x16x16xf32, #tpu.memory_space<vmem>>, %arg8: memref<16x32xf32, #tpu.memory_space<vmem>>) attributes {dimension_semantics = [], scalar_prefetch = 0 : i64, scratch_operands = 1 : i64, tpu.core_type = #tpu.core_type<tc>} {
    %c0 = arith.constant 0 : index
    %c0_0 = arith.constant 0 : index
    %0 = vector.load %arg0[%c0, %c0_0] : memref<16x32xf32, #tpu.memory_space<vmem>>, vector<16x32xf32>
    %1 = tpu.iota {dimensions = array<i32: 0>} : vector<16x16xi32>
    %2 = tpu.iota {dimensions = array<i32: 1>} : vector<16x16xi32>
    %c2_i32 = arith.constant 2 : i32
    %c0_i32 = arith.constant 0 : i32
    %3 = arith.cmpi eq, %c2_i32, %c0_i32 : i32
    %c1_i32 = arith.constant 1 : i32
    %4 = arith.select %3, %c1_i32, %c2_i32 : i32
    %5 = vector.broadcast %4 : i32 to vector<16x16xi32>
    %6 = arith.remsi %1, %5 : vector<16x16xi32>
    %c0_i32_1 = arith.constant 0 : i32
    %7 = vector.broadcast %c0_i32_1 : i32 to vector<16x16xi32>
    %8 = arith.cmpi ne, %6, %7 : vector<16x16xi32>
    %c0_i32_2 = arith.constant 0 : i32
    %9 = vector.broadcast %c0_i32_2 : i32 to vector<16x16xi32>
    %10 = arith.cmpi slt, %6, %9 : vector<16x16xi32>
    %c0_i32_3 = arith.constant 0 : i32
    %11 = arith.cmpi slt, %4, %c0_i32_3 : i32
    %12 = vector.broadcast %11 : i1 to vector<16x16xi1>
    %13 = vector.broadcast %12 : vector<16x16xi1> to vector<16x16xi1>
    %14 = arith.xori %10, %13 : vector<16x16xi1>
    %15 = arith.andi %14, %8 : vector<16x16xi1>
    %16 = vector.broadcast %4 : i32 to vector<16x16xi32>
    %17 = arith.addi %6, %16 : vector<16x16xi32>
    %18 = arith.select %15, %17, %6 : vector<16x16xi1>, vector<16x16xi32>
    %c2_i32_4 = arith.constant 2 : i32
    %c0_i32_5 = arith.constant 0 : i32
    %19 = arith.cmpi eq, %c2_i32_4, %c0_i32_5 : i32
    %c1_i32_6 = arith.constant 1 : i32
    %20 = arith.select %19, %c1_i32_6, %c2_i32_4 : i32
    %21 = vector.broadcast %20 : i32 to vector<16x16xi32>
    %22 = arith.remsi %2, %21 : vector<16x16xi32>
    %c0_i32_7 = arith.constant 0 : i32
    %23 = vector.broadcast %c0_i32_7 : i32 to vector<16x16xi32>
    %24 = arith.cmpi ne, %22, %23 : vector<16x16xi32>
    %c0_i32_8 = arith.constant 0 : i32
    %25 = vector.broadcast %c0_i32_8 : i32 to vector<16x16xi32>
    %26 = arith.cmpi slt, %22, %25 : vector<16x16xi32>
    %c0_i32_9 = arith.constant 0 : i32
    %27 = arith.cmpi slt, %20, %c0_i32_9 : i32
    %28 = vector.broadcast %27 : i1 to vector<16x16xi1>
    %29 = vector.broadcast %28 : vector<16x16xi1> to vector<16x16xi1>
    %30 = arith.xori %26, %29 : vector<16x16xi1>
    %31 = arith.andi %30, %24 : vector<16x16xi1>
    %32 = vector.broadcast %20 : i32 to vector<16x16xi32>
    %33 = arith.addi %22, %32 : vector<16x16xi32>
    %34 = arith.select %31, %33, %22 : vector<16x16xi1>, vector<16x16xi32>
    %35 = arith.cmpi eq, %18, %34 : vector<16x16xi32>
    %cst = arith.constant 0.000000e+00 : f32
    %cst_10 = arith.constant -1.000000e+30 : f32
    %36 = vector.broadcast %cst : f32 to vector<16x16xf32>
    %37 = vector.broadcast %cst_10 : f32 to vector<16x16xf32>
    %38 = arith.select %35, %36, %37 : vector<16x16xi1>, vector<16x16xf32>
    %c0_11 = arith.constant 0 : index
    %c0_12 = arith.constant 0 : index
    %c0_13 = arith.constant 0 : index
    %39 = vector.load %arg1[%c0_11, %c0_12, %c0_13] : memref<2x32x128xf32, #tpu.memory_space<vmem>>, vector<1x32x128xf32>
    %40 = vector.shape_cast %39 : vector<1x32x128xf32> to vector<32x128xf32>
    %cst_14 = arith.constant dense<0.000000e+00> : vector<16x128xf32>
    %41 = tpu.matmul %0, %40, %cst_14 {dimension_numbers = #tpu.dot_dimension_numbers<[1], [0], [0], [1], [0, 0, 1, 1], [], []>} : vector<16x32xf32>, vector<32x128xf32>, vector<16x128xf32> -> vector<16x128xf32>
    %c0_15 = arith.constant 0 : index
    %c0_16 = arith.constant 0 : index
    %42 = vector.load %arg5[%c0_15, %c0_16] : memref<18x128xf32, #tpu.memory_space<vmem>>, vector<1x128xf32>
    %43 = vector.broadcast %42 : vector<1x128xf32> to vector<16x128xf32>
    %44 = arith.addf %41, %43 : vector<16x128xf32>
    %cst_17 = arith.constant 0.000000e+00 : f32
    %45 = vector.broadcast %cst_17 : f32 to vector<16x16xf32>
    %46 = vector.extract_strided_slice %44 {offsets = [0, 0], sizes = [16, 8], strides = [1, 1]} : vector<16x128xf32> to vector<16x8xf32>
    %47 = vector.extract_strided_slice %44 {offsets = [0, 32], sizes = [16, 8], strides = [1, 1]} : vector<16x128xf32> to vector<16x8xf32>
    %48 = vector.extract_strided_slice %44 {offsets = [0, 64], sizes = [16, 8], strides = [1, 1]} : vector<16x128xf32> to vector<16x8xf32>
    %cst_18 = arith.constant dense<0.000000e+00> : vector<16x16xf32>
    %49 = tpu.matmul %46, %47, %cst_18 {dimension_numbers = #tpu.dot_dimension_numbers<[1], [1], [0], [0], [0, 0, 1, 0], [], []>} : vector<16x8xf32>, vector<16x8xf32>, vector<16x16xf32> -> vector<16x16xf32>
    %50 = arith.addf %49, %38 : vector<16x16xf32>
    %cst_19 = arith.constant dense<0xFF800000> : vector<16xf32>
    %51 = vector.multi_reduction <maximumf>, %50, %cst_19 [1] : vector<16x16xf32> to vector<16xf32>
    %52 = vector.shape_cast %51 : vector<16xf32> to vector<16x1xf32>
    %53 = vector.broadcast %52 : vector<16x1xf32> to vector<16x16xf32>
    %54 = arith.subf %50, %53 : vector<16x16xf32>
    %55 = math.exp %54 : vector<16x16xf32>
    %cst_20 = arith.constant dense<0.000000e+00> : vector<16xf32>
    %56 = vector.multi_reduction <add>, %55, %cst_20 [1] : vector<16x16xf32> to vector<16xf32>
    %57 = vector.shape_cast %56 : vector<16xf32> to vector<16x1xf32>
    %58 = tpu.reciprocal %57 {approx = true} : vector<16x1xf32> -> vector<16x1xf32>
    %59 = vector.broadcast %58 : vector<16x1xf32> to vector<16x16xf32>
    %60 = arith.mulf %55, %59 : vector<16x16xf32>
    %61 = arith.addf %45, %60 : vector<16x16xf32>
    %cst_21 = arith.constant dense<0.000000e+00> : vector<16x8xf32>
    %62 = tpu.matmul %60, %48, %cst_21 {dimension_numbers = #tpu.dot_dimension_numbers<[1], [0], [0], [1], [0, 0, 1, 1], [], []>} : vector<16x16xf32>, vector<16x8xf32>, vector<16x8xf32> -> vector<16x8xf32>
    %c0_22 = arith.constant 0 : index
    %c0_23 = arith.constant 0 : index
    %63 = vector.load %arg8[%c0_22, %c0_23] : memref<16x32xf32, #tpu.memory_space<vmem>>, vector<16x8xf32>
    tpu.vector_store %arg8[%c0_22, %c0_23], %62 {strides = array<i32>} : memref<16x32xf32, #tpu.memory_space<vmem>>, vector<16x8xf32>,
    %64 = vector.extract_strided_slice %44 {offsets = [0, 8], sizes = [16, 8], strides = [1, 1]} : vector<16x128xf32> to vector<16x8xf32>
    %65 = vector.extract_strided_slice %44 {offsets = [0, 40], sizes = [16, 8], strides = [1, 1]} : vector<16x128xf32> to vector<16x8xf32>
    %66 = vector.extract_strided_slice %44 {offsets = [0, 72], sizes = [16, 8], strides = [1, 1]} : vector<16x128xf32> to vector<16x8xf32>
    %cst_24 = arith.constant dense<0.000000e+00> : vector<16x16xf32>
    %67 = tpu.matmul %64, %65, %cst_24 {dimension_numbers = #tpu.dot_dimension_numbers<[1], [1], [0], [0], [0, 0, 1, 0], [], []>} : vector<16x8xf32>, vector<16x8xf32>, vector<16x16xf32> -> vector<16x16xf32>
    %68 = arith.addf %67, %38 : vector<16x16xf32>
    %cst_25 = arith.constant dense<0xFF800000> : vector<16xf32>
    %69 = vector.multi_reduction <maximumf>, %68, %cst_25 [1] : vector<16x16xf32> to vector<16xf32>
    %70 = vector.shape_cast %69 : vector<16xf32> to vector<16x1xf32>
    %71 = vector.broadcast %70 : vector<16x1xf32> to vector<16x16xf32>
    %72 = arith.subf %68, %71 : vector<16x16xf32>
    %73 = math.exp %72 : vector<16x16xf32>
    %cst_26 = arith.constant dense<0.000000e+00> : vector<16xf32>
    %74 = vector.multi_reduction <add>, %73, %cst_26 [1] : vector<16x16xf32> to vector<16xf32>
    %75 = vector.shape_cast %74 : vector<16xf32> to vector<16x1xf32>
    %76 = tpu.reciprocal %75 {approx = true} : vector<16x1xf32> -> vector<16x1xf32>
    %77 = vector.broadcast %76 : vector<16x1xf32> to vector<16x16xf32>
    %78 = arith.mulf %73, %77 : vector<16x16xf32>
    %79 = arith.addf %61, %78 : vector<16x16xf32>
    %cst_27 = arith.constant dense<0.000000e+00> : vector<16x8xf32>
    %80 = tpu.matmul %78, %66, %cst_27 {dimension_numbers = #tpu.dot_dimension_numbers<[1], [0], [0], [1], [0, 0, 1, 1], [], []>} : vector<16x16xf32>, vector<16x8xf32>, vector<16x8xf32> -> vector<16x8xf32>
    %c0_28 = arith.constant 0 : index
    %c8 = arith.constant 8 : index
    %81 = vector.load %arg8[%c0_28, %c8] : memref<16x32xf32, #tpu.memory_space<vmem>>, vector<16x8xf32>
    tpu.vector_store %arg8[%c0_28, %c8], %80 {strides = array<i32>} : memref<16x32xf32, #tpu.memory_space<vmem>>, vector<16x8xf32>,
    %82 = vector.extract_strided_slice %44 {offsets = [0, 16], sizes = [16, 8], strides = [1, 1]} : vector<16x128xf32> to vector<16x8xf32>
    %83 = vector.extract_strided_slice %44 {offsets = [0, 48], sizes = [16, 8], strides = [1, 1]} : vector<16x128xf32> to vector<16x8xf32>
    %84 = vector.extract_strided_slice %44 {offsets = [0, 80], sizes = [16, 8], strides = [1, 1]} : vector<16x128xf32> to vector<16x8xf32>
    %cst_29 = arith.constant dense<0.000000e+00> : vector<16x16xf32>
    %85 = tpu.matmul %82, %83, %cst_29 {dimension_numbers = #tpu.dot_dimension_numbers<[1], [1], [0], [0], [0, 0, 1, 0], [], []>} : vector<16x8xf32>, vector<16x8xf32>, vector<16x16xf32> -> vector<16x16xf32>
    %86 = arith.addf %85, %38 : vector<16x16xf32>
    %cst_30 = arith.constant dense<0xFF800000> : vector<16xf32>
    %87 = vector.multi_reduction <maximumf>, %86, %cst_30 [1] : vector<16x16xf32> to vector<16xf32>
    %88 = vector.shape_cast %87 : vector<16xf32> to vector<16x1xf32>
    %89 = vector.broadcast %88 : vector<16x1xf32> to vector<16x16xf32>
    %90 = arith.subf %86, %89 : vector<16x16xf32>
    %91 = math.exp %90 : vector<16x16xf32>
    %cst_31 = arith.constant dense<0.000000e+00> : vector<16xf32>
    %92 = vector.multi_reduction <add>, %91, %cst_31 [1] : vector<16x16xf32> to vector<16xf32>
    %93 = vector.shape_cast %92 : vector<16xf32> to vector<16x1xf32>
    %94 = tpu.reciprocal %93 {approx = true} : vector<16x1xf32> -> vector<16x1xf32>
    %95 = vector.broadcast %94 : vector<16x1xf32> to vector<16x16xf32>
    %96 = arith.mulf %91, %95 : vector<16x16xf32>
    %97 = arith.addf %79, %96 : vector<16x16xf32>
    %cst_32 = arith.constant dense<0.000000e+00> : vector<16x8xf32>
    %98 = tpu.matmul %96, %84, %cst_32 {dimension_numbers = #tpu.dot_dimension_numbers<[1], [0], [0], [1], [0, 0, 1, 1], [], []>} : vector<16x16xf32>, vector<16x8xf32>, vector<16x8xf32> -> vector<16x8xf32>
    %c0_33 = arith.constant 0 : index
    %c16 = arith.constant 16 : index
    %99 = vector.load %arg8[%c0_33, %c16] : memref<16x32xf32, #tpu.memory_space<vmem>>, vector<16x8xf32>
    tpu.vector_store %arg8[%c0_33, %c16], %98 {strides = array<i32>} : memref<16x32xf32, #tpu.memory_space<vmem>>, vector<16x8xf32>,
    %100 = vector.extract_strided_slice %44 {offsets = [0, 24], sizes = [16, 8], strides = [1, 1]} : vector<16x128xf32> to vector<16x8xf32>
    %101 = vector.extract_strided_slice %44 {offsets = [0, 56], sizes = [16, 8], strides = [1, 1]} : vector<16x128xf32> to vector<16x8xf32>
    %102 = vector.extract_strided_slice %44 {offsets = [0, 88], sizes = [16, 8], strides = [1, 1]} : vector<16x128xf32> to vector<16x8xf32>
    %cst_34 = arith.constant dense<0.000000e+00> : vector<16x16xf32>
    %103 = tpu.matmul %100, %101, %cst_34 {dimension_numbers = #tpu.dot_dimension_numbers<[1], [1], [0], [0], [0, 0, 1, 0], [], []>} : vector<16x8xf32>, vector<16x8xf32>, vector<16x16xf32> -> vector<16x16xf32>
    %104 = arith.addf %103, %38 : vector<16x16xf32>
    %cst_35 = arith.constant dense<0xFF800000> : vector<16xf32>
    %105 = vector.multi_reduction <maximumf>, %104, %cst_35 [1] : vector<16x16xf32> to vector<16xf32>
    %106 = vector.shape_cast %105 : vector<16xf32> to vector<16x1xf32>
    %107 = vector.broadcast %106 : vector<16x1xf32> to vector<16x16xf32>
    %108 = arith.subf %104, %107 : vector<16x16xf32>
    %109 = math.exp %108 : vector<16x16xf32>
    %cst_36 = arith.constant dense<0.000000e+00> : vector<16xf32>
    %110 = vector.multi_reduction <add>, %109, %cst_36 [1] : vector<16x16xf32> to vector<16xf32>
    %111 = vector.shape_cast %110 : vector<16xf32> to vector<16x1xf32>
    %112 = tpu.reciprocal %111 {approx = true} : vector<16x1xf32> -> vector<16x1xf32>
    %113 = vector.broadcast %112 : vector<16x1xf32> to vector<16x16xf32>
    %114 = arith.mulf %109, %113 : vector<16x16xf32>
    %115 = arith.addf %97, %114 : vector<16x16xf32>
    %cst_37 = arith.constant dense<0.000000e+00> : vector<16x8xf32>
    %116 = tpu.matmul %114, %102, %cst_37 {dimension_numbers = #tpu.dot_dimension_numbers<[1], [0], [0], [1], [0, 0, 1, 1], [], []>} : vector<16x16xf32>, vector<16x8xf32>, vector<16x8xf32> -> vector<16x8xf32>
    %c0_38 = arith.constant 0 : index
    %c24 = arith.constant 24 : index
    %117 = vector.load %arg8[%c0_38, %c24] : memref<16x32xf32, #tpu.memory_space<vmem>>, vector<16x8xf32>
    tpu.vector_store %arg8[%c0_38, %c24], %116 {strides = array<i32>} : memref<16x32xf32, #tpu.memory_space<vmem>>, vector<16x8xf32>,
    %cst_39 = arith.constant 2.500000e-01 : f32
    %118 = vector.broadcast %cst_39 : f32 to vector<16x16xf32>
    %119 = arith.mulf %115, %118 : vector<16x16xf32>
    %c0_40 = arith.constant 0 : index
    %c0_41 = arith.constant 0 : index
    %c0_42 = arith.constant 0 : index
    %120 = vector.load %arg7[%c0_40, %c0_41, %c0_42] : memref<2x16x16xf32, #tpu.memory_space<vmem>>, vector<1x16x16xf32>
    %121 = vector.shape_cast %120 : vector<1x16x16xf32> to vector<16x16xf32>
    %122 = vector.shape_cast %119 : vector<16x16xf32> to vector<1x16x16xf32>
    tpu.vector_store %arg7[%c0_40, %c0_41, %c0_42], %122 {strides = array<i32>} : memref<2x16x16xf32, #tpu.memory_space<vmem>>, vector<1x16x16xf32>,
    %c0_43 = arith.constant 0 : index
    %c0_44 = arith.constant 0 : index
    %123 = vector.load %arg8[%c0_43, %c0_44] : memref<16x32xf32, #tpu.memory_space<vmem>>, vector<16x32xf32>
    %c0_45 = arith.constant 0 : index
    %c0_46 = arith.constant 0 : index
    %c0_47 = arith.constant 0 : index
    %124 = vector.load %arg2[%c0_45, %c0_46, %c0_47] : memref<2x32x32xf32, #tpu.memory_space<vmem>>, vector<1x32x32xf32>
    %125 = vector.shape_cast %124 : vector<1x32x32xf32> to vector<32x32xf32>
    %cst_48 = arith.constant dense<0.000000e+00> : vector<16x32xf32>
    %126 = tpu.matmul %123, %125, %cst_48 {dimension_numbers = #tpu.dot_dimension_numbers<[1], [0], [0], [1], [0, 0, 1, 1], [], []>} : vector<16x32xf32>, vector<32x32xf32>, vector<16x32xf32> -> vector<16x32xf32>
    %c1 = arith.constant 1 : index
    %c0_49 = arith.constant 0 : index
    %127 = vector.load %arg5[%c1, %c0_49] : memref<18x128xf32, #tpu.memory_space<vmem>>, vector<1x32xf32>
    %128 = vector.broadcast %127 : vector<1x32xf32> to vector<16x32xf32>
    %129 = arith.addf %126, %128 : vector<16x32xf32>
    %130 = arith.addf %0, %129 : vector<16x32xf32>
    %c2 = arith.constant 2 : index
    %c0_50 = arith.constant 0 : index
    %131 = vector.load %arg5[%c2, %c0_50] : memref<18x128xf32, #tpu.memory_space<vmem>>, vector<1x32xf32>
    %c3 = arith.constant 3 : index
    %c0_51 = arith.constant 0 : index
    %132 = vector.load %arg5[%c3, %c0_51] : memref<18x128xf32, #tpu.memory_space<vmem>>, vector<1x32xf32>
    %cst_52 = arith.constant dense<0.000000e+00> : vector<16xf32>
    %133 = vector.multi_reduction <add>, %130, %cst_52 [1] : vector<16x32xf32> to vector<16xf32>
    %134 = vector.shape_cast %133 : vector<16xf32> to vector<16x1xf32>
    %cst_53 = arith.constant 3.200000e+01 : f32
    %135 = vector.broadcast %cst_53 : f32 to vector<16x1xf32>
    %136 = arith.divf %134, %135 : vector<16x1xf32>
    %137 = vector.broadcast %136 : vector<16x1xf32> to vector<16x32xf32>
    %138 = arith.subf %130, %137 : vector<16x32xf32>
    %139 = arith.mulf %138, %138 : vector<16x32xf32>
    %cst_54 = arith.constant dense<0.000000e+00> : vector<16xf32>
    %140 = vector.multi_reduction <add>, %139, %cst_54 [1] : vector<16x32xf32> to vector<16xf32>
    %141 = vector.shape_cast %140 : vector<16xf32> to vector<16x1xf32>
    %cst_55 = arith.constant 3.200000e+01 : f32
    %142 = vector.broadcast %cst_55 : f32 to vector<16x1xf32>
    %143 = arith.divf %141, %142 : vector<16x1xf32>
    %cst_56 = arith.constant 9.99999974E-6 : f32
    %144 = vector.broadcast %cst_56 : f32 to vector<16x1xf32>
    %145 = arith.addf %143, %144 : vector<16x1xf32>
    %146 = math.rsqrt %145 : vector<16x1xf32>
    %147 = vector.broadcast %146 : vector<16x1xf32> to vector<16x32xf32>
    %148 = arith.mulf %138, %147 : vector<16x32xf32>
    %149 = vector.broadcast %131 : vector<1x32xf32> to vector<16x32xf32>
    %150 = arith.mulf %148, %149 : vector<16x32xf32>
    %151 = vector.broadcast %132 : vector<1x32xf32> to vector<16x32xf32>
    %152 = arith.addf %150, %151 : vector<16x32xf32>
    %c0_57 = arith.constant 0 : index
    %c0_58 = arith.constant 0 : index
    %153 = vector.load %arg3[%c0_57, %c0_58] : memref<32x128xf32, #tpu.memory_space<vmem>>, vector<32x64xf32>
    %cst_59 = arith.constant dense<0.000000e+00> : vector<16x64xf32>
    %154 = tpu.matmul %152, %153, %cst_59 {dimension_numbers = #tpu.dot_dimension_numbers<[1], [0], [0], [1], [0, 0, 1, 1], [], []>} : vector<16x32xf32>, vector<32x64xf32>, vector<16x64xf32> -> vector<16x64xf32>
    %c4 = arith.constant 4 : index
    %c0_60 = arith.constant 0 : index
    %155 = vector.load %arg5[%c4, %c0_60] : memref<18x128xf32, #tpu.memory_space<vmem>>, vector<1x64xf32>
    %156 = vector.broadcast %155 : vector<1x64xf32> to vector<16x64xf32>
    %157 = arith.addf %154, %156 : vector<16x64xf32>
    %cst_61 = arith.constant 0.000000e+00 : f32
    %158 = vector.broadcast %cst_61 : f32 to vector<16x64xf32>
    %159 = arith.maximumf %157, %158 : vector<16x64xf32>
    %c0_62 = arith.constant 0 : index
    %c0_63 = arith.constant 0 : index
    %c0_64 = arith.constant 0 : index
    %160 = vector.load %arg4[%c0_62, %c0_63, %c0_64] : memref<2x64x32xf32, #tpu.memory_space<vmem>>, vector<1x64x32xf32>
    %161 = vector.shape_cast %160 : vector<1x64x32xf32> to vector<64x32xf32>
    %cst_65 = arith.constant dense<0.000000e+00> : vector<16x32xf32>
    %162 = tpu.matmul %159, %161, %cst_65 {dimension_numbers = #tpu.dot_dimension_numbers<[1], [0], [0], [1], [0, 0, 1, 1], [], []>} : vector<16x64xf32>, vector<64x32xf32>, vector<16x32xf32> -> vector<16x32xf32>
    %c5 = arith.constant 5 : index
    %c0_66 = arith.constant 0 : index
    %163 = vector.load %arg5[%c5, %c0_66] : memref<18x128xf32, #tpu.memory_space<vmem>>, vector<1x32xf32>
    %164 = vector.broadcast %163 : vector<1x32xf32> to vector<16x32xf32>
    %165 = arith.addf %162, %164 : vector<16x32xf32>
    %166 = arith.addf %152, %165 : vector<16x32xf32>
    %c6 = arith.constant 6 : index
    %c0_67 = arith.constant 0 : index
    %167 = vector.load %arg5[%c6, %c0_67] : memref<18x128xf32, #tpu.memory_space<vmem>>, vector<1x32xf32>
    %c7 = arith.constant 7 : index
    %c0_68 = arith.constant 0 : index
    %168 = vector.load %arg5[%c7, %c0_68] : memref<18x128xf32, #tpu.memory_space<vmem>>, vector<1x32xf32>
    %cst_69 = arith.constant dense<0.000000e+00> : vector<16xf32>
    %169 = vector.multi_reduction <add>, %166, %cst_69 [1] : vector<16x32xf32> to vector<16xf32>
    %170 = vector.shape_cast %169 : vector<16xf32> to vector<16x1xf32>
    %cst_70 = arith.constant 3.200000e+01 : f32
    %171 = vector.broadcast %cst_70 : f32 to vector<16x1xf32>
    %172 = arith.divf %170, %171 : vector<16x1xf32>
    %173 = vector.broadcast %172 : vector<16x1xf32> to vector<16x32xf32>
    %174 = arith.subf %166, %173 : vector<16x32xf32>
    %175 = arith.mulf %174, %174 : vector<16x32xf32>
    %cst_71 = arith.constant dense<0.000000e+00> : vector<16xf32>
    %176 = vector.multi_reduction <add>, %175, %cst_71 [1] : vector<16x32xf32> to vector<16xf32>
    %177 = vector.shape_cast %176 : vector<16xf32> to vector<16x1xf32>
    %cst_72 = arith.constant 3.200000e+01 : f32
    %178 = vector.broadcast %cst_72 : f32 to vector<16x1xf32>
    %179 = arith.divf %177, %178 : vector<16x1xf32>
    %cst_73 = arith.constant 9.99999974E-6 : f32
    %180 = vector.broadcast %cst_73 : f32 to vector<16x1xf32>
    %181 = arith.addf %179, %180 : vector<16x1xf32>
    %182 = math.rsqrt %181 : vector<16x1xf32>
    %183 = vector.broadcast %182 : vector<16x1xf32> to vector<16x32xf32>
    %184 = arith.mulf %174, %183 : vector<16x32xf32>
    %185 = vector.broadcast %167 : vector<1x32xf32> to vector<16x32xf32>
    %186 = arith.mulf %184, %185 : vector<16x32xf32>
    %187 = vector.broadcast %168 : vector<1x32xf32> to vector<16x32xf32>
    %188 = arith.addf %186, %187 : vector<16x32xf32>
    %c1_74 = arith.constant 1 : index
    %c0_75 = arith.constant 0 : index
    %c0_76 = arith.constant 0 : index
    %189 = vector.load %arg1[%c1_74, %c0_75, %c0_76] : memref<2x32x128xf32, #tpu.memory_space<vmem>>, vector<1x32x128xf32>
    %190 = vector.shape_cast %189 : vector<1x32x128xf32> to vector<32x128xf32>
    %cst_77 = arith.constant dense<0.000000e+00> : vector<16x128xf32>
    %191 = tpu.matmul %188, %190, %cst_77 {dimension_numbers = #tpu.dot_dimension_numbers<[1], [0], [0], [1], [0, 0, 1, 1], [], []>} : vector<16x32xf32>, vector<32x128xf32>, vector<16x128xf32> -> vector<16x128xf32>
    %c8_78 = arith.constant 8 : index
    %c0_79 = arith.constant 0 : index
    %192 = vector.load %arg5[%c8_78, %c0_79] : memref<18x128xf32, #tpu.memory_space<vmem>>, vector<1x128xf32>
    %193 = vector.broadcast %192 : vector<1x128xf32> to vector<16x128xf32>
    %194 = arith.addf %191, %193 : vector<16x128xf32>
    %cst_80 = arith.constant 0.000000e+00 : f32
    %195 = vector.broadcast %cst_80 : f32 to vector<16x16xf32>
    %196 = vector.extract_strided_slice %194 {offsets = [0, 0], sizes = [16, 8], strides = [1, 1]} : vector<16x128xf32> to vector<16x8xf32>
    %197 = vector.extract_strided_slice %194 {offsets = [0, 32], sizes = [16, 8], strides = [1, 1]} : vector<16x128xf32> to vector<16x8xf32>
    %198 = vector.extract_strided_slice %194 {offsets = [0, 64], sizes = [16, 8], strides = [1, 1]} : vector<16x128xf32> to vector<16x8xf32>
    %cst_81 = arith.constant dense<0.000000e+00> : vector<16x16xf32>
    %199 = tpu.matmul %196, %197, %cst_81 {dimension_numbers = #tpu.dot_dimension_numbers<[1], [1], [0], [0], [0, 0, 1, 0], [], []>} : vector<16x8xf32>, vector<16x8xf32>, vector<16x16xf32> -> vector<16x16xf32>
    %200 = arith.addf %199, %38 : vector<16x16xf32>
    %cst_82 = arith.constant dense<0xFF800000> : vector<16xf32>
    %201 = vector.multi_reduction <maximumf>, %200, %cst_82 [1] : vector<16x16xf32> to vector<16xf32>
    %202 = vector.shape_cast %201 : vector<16xf32> to vector<16x1xf32>
    %203 = vector.broadcast %202 : vector<16x1xf32> to vector<16x16xf32>
    %204 = arith.subf %200, %203 : vector<16x16xf32>
    %205 = math.exp %204 : vector<16x16xf32>
    %cst_83 = arith.constant dense<0.000000e+00> : vector<16xf32>
    %206 = vector.multi_reduction <add>, %205, %cst_83 [1] : vector<16x16xf32> to vector<16xf32>
    %207 = vector.shape_cast %206 : vector<16xf32> to vector<16x1xf32>
    %208 = tpu.reciprocal %207 {approx = true} : vector<16x1xf32> -> vector<16x1xf32>
    %209 = vector.broadcast %208 : vector<16x1xf32> to vector<16x16xf32>
    %210 = arith.mulf %205, %209 : vector<16x16xf32>
    %211 = arith.addf %195, %210 : vector<16x16xf32>
    %cst_84 = arith.constant dense<0.000000e+00> : vector<16x8xf32>
    %212 = tpu.matmul %210, %198, %cst_84 {dimension_numbers = #tpu.dot_dimension_numbers<[1], [0], [0], [1], [0, 0, 1, 1], [], []>} : vector<16x16xf32>, vector<16x8xf32>, vector<16x8xf32> -> vector<16x8xf32>
    %c0_85 = arith.constant 0 : index
    %c0_86 = arith.constant 0 : index
    %213 = vector.load %arg8[%c0_85, %c0_86] : memref<16x32xf32, #tpu.memory_space<vmem>>, vector<16x8xf32>
    tpu.vector_store %arg8[%c0_85, %c0_86], %212 {strides = array<i32>} : memref<16x32xf32, #tpu.memory_space<vmem>>, vector<16x8xf32>,
    %214 = vector.extract_strided_slice %194 {offsets = [0, 8], sizes = [16, 8], strides = [1, 1]} : vector<16x128xf32> to vector<16x8xf32>
    %215 = vector.extract_strided_slice %194 {offsets = [0, 40], sizes = [16, 8], strides = [1, 1]} : vector<16x128xf32> to vector<16x8xf32>
    %216 = vector.extract_strided_slice %194 {offsets = [0, 72], sizes = [16, 8], strides = [1, 1]} : vector<16x128xf32> to vector<16x8xf32>
    %cst_87 = arith.constant dense<0.000000e+00> : vector<16x16xf32>
    %217 = tpu.matmul %214, %215, %cst_87 {dimension_numbers = #tpu.dot_dimension_numbers<[1], [1], [0], [0], [0, 0, 1, 0], [], []>} : vector<16x8xf32>, vector<16x8xf32>, vector<16x16xf32> -> vector<16x16xf32>
    %218 = arith.addf %217, %38 : vector<16x16xf32>
    %cst_88 = arith.constant dense<0xFF800000> : vector<16xf32>
    %219 = vector.multi_reduction <maximumf>, %218, %cst_88 [1] : vector<16x16xf32> to vector<16xf32>
    %220 = vector.shape_cast %219 : vector<16xf32> to vector<16x1xf32>
    %221 = vector.broadcast %220 : vector<16x1xf32> to vector<16x16xf32>
    %222 = arith.subf %218, %221 : vector<16x16xf32>
    %223 = math.exp %222 : vector<16x16xf32>
    %cst_89 = arith.constant dense<0.000000e+00> : vector<16xf32>
    %224 = vector.multi_reduction <add>, %223, %cst_89 [1] : vector<16x16xf32> to vector<16xf32>
    %225 = vector.shape_cast %224 : vector<16xf32> to vector<16x1xf32>
    %226 = tpu.reciprocal %225 {approx = true} : vector<16x1xf32> -> vector<16x1xf32>
    %227 = vector.broadcast %226 : vector<16x1xf32> to vector<16x16xf32>
    %228 = arith.mulf %223, %227 : vector<16x16xf32>
    %229 = arith.addf %211, %228 : vector<16x16xf32>
    %cst_90 = arith.constant dense<0.000000e+00> : vector<16x8xf32>
    %230 = tpu.matmul %228, %216, %cst_90 {dimension_numbers = #tpu.dot_dimension_numbers<[1], [0], [0], [1], [0, 0, 1, 1], [], []>} : vector<16x16xf32>, vector<16x8xf32>, vector<16x8xf32> -> vector<16x8xf32>
    %c0_91 = arith.constant 0 : index
    %c8_92 = arith.constant 8 : index
    %231 = vector.load %arg8[%c0_91, %c8_92] : memref<16x32xf32, #tpu.memory_space<vmem>>, vector<16x8xf32>
    tpu.vector_store %arg8[%c0_91, %c8_92], %230 {strides = array<i32>} : memref<16x32xf32, #tpu.memory_space<vmem>>, vector<16x8xf32>,
    %232 = vector.extract_strided_slice %194 {offsets = [0, 16], sizes = [16, 8], strides = [1, 1]} : vector<16x128xf32> to vector<16x8xf32>
    %233 = vector.extract_strided_slice %194 {offsets = [0, 48], sizes = [16, 8], strides = [1, 1]} : vector<16x128xf32> to vector<16x8xf32>
    %234 = vector.extract_strided_slice %194 {offsets = [0, 80], sizes = [16, 8], strides = [1, 1]} : vector<16x128xf32> to vector<16x8xf32>
    %cst_93 = arith.constant dense<0.000000e+00> : vector<16x16xf32>
    %235 = tpu.matmul %232, %233, %cst_93 {dimension_numbers = #tpu.dot_dimension_numbers<[1], [1], [0], [0], [0, 0, 1, 0], [], []>} : vector<16x8xf32>, vector<16x8xf32>, vector<16x16xf32> -> vector<16x16xf32>
    %236 = arith.addf %235, %38 : vector<16x16xf32>
    %cst_94 = arith.constant dense<0xFF800000> : vector<16xf32>
    %237 = vector.multi_reduction <maximumf>, %236, %cst_94 [1] : vector<16x16xf32> to vector<16xf32>
    %238 = vector.shape_cast %237 : vector<16xf32> to vector<16x1xf32>
    %239 = vector.broadcast %238 : vector<16x1xf32> to vector<16x16xf32>
    %240 = arith.subf %236, %239 : vector<16x16xf32>
    %241 = math.exp %240 : vector<16x16xf32>
    %cst_95 = arith.constant dense<0.000000e+00> : vector<16xf32>
    %242 = vector.multi_reduction <add>, %241, %cst_95 [1] : vector<16x16xf32> to vector<16xf32>
    %243 = vector.shape_cast %242 : vector<16xf32> to vector<16x1xf32>
    %244 = tpu.reciprocal %243 {approx = true} : vector<16x1xf32> -> vector<16x1xf32>
    %245 = vector.broadcast %244 : vector<16x1xf32> to vector<16x16xf32>
    %246 = arith.mulf %241, %245 : vector<16x16xf32>
    %247 = arith.addf %229, %246 : vector<16x16xf32>
    %cst_96 = arith.constant dense<0.000000e+00> : vector<16x8xf32>
    %248 = tpu.matmul %246, %234, %cst_96 {dimension_numbers = #tpu.dot_dimension_numbers<[1], [0], [0], [1], [0, 0, 1, 1], [], []>} : vector<16x16xf32>, vector<16x8xf32>, vector<16x8xf32> -> vector<16x8xf32>
    %c0_97 = arith.constant 0 : index
    %c16_98 = arith.constant 16 : index
    %249 = vector.load %arg8[%c0_97, %c16_98] : memref<16x32xf32, #tpu.memory_space<vmem>>, vector<16x8xf32>
    tpu.vector_store %arg8[%c0_97, %c16_98], %248 {strides = array<i32>} : memref<16x32xf32, #tpu.memory_space<vmem>>, vector<16x8xf32>,
    %250 = vector.extract_strided_slice %194 {offsets = [0, 24], sizes = [16, 8], strides = [1, 1]} : vector<16x128xf32> to vector<16x8xf32>
    %251 = vector.extract_strided_slice %194 {offsets = [0, 56], sizes = [16, 8], strides = [1, 1]} : vector<16x128xf32> to vector<16x8xf32>
    %252 = vector.extract_strided_slice %194 {offsets = [0, 88], sizes = [16, 8], strides = [1, 1]} : vector<16x128xf32> to vector<16x8xf32>
    %cst_99 = arith.constant dense<0.000000e+00> : vector<16x16xf32>
    %253 = tpu.matmul %250, %251, %cst_99 {dimension_numbers = #tpu.dot_dimension_numbers<[1], [1], [0], [0], [0, 0, 1, 0], [], []>} : vector<16x8xf32>, vector<16x8xf32>, vector<16x16xf32> -> vector<16x16xf32>
    %254 = arith.addf %253, %38 : vector<16x16xf32>
    %cst_100 = arith.constant dense<0xFF800000> : vector<16xf32>
    %255 = vector.multi_reduction <maximumf>, %254, %cst_100 [1] : vector<16x16xf32> to vector<16xf32>
    %256 = vector.shape_cast %255 : vector<16xf32> to vector<16x1xf32>
    %257 = vector.broadcast %256 : vector<16x1xf32> to vector<16x16xf32>
    %258 = arith.subf %254, %257 : vector<16x16xf32>
    %259 = math.exp %258 : vector<16x16xf32>
    %cst_101 = arith.constant dense<0.000000e+00> : vector<16xf32>
    %260 = vector.multi_reduction <add>, %259, %cst_101 [1] : vector<16x16xf32> to vector<16xf32>
    %261 = vector.shape_cast %260 : vector<16xf32> to vector<16x1xf32>
    %262 = tpu.reciprocal %261 {approx = true} : vector<16x1xf32> -> vector<16x1xf32>
    %263 = vector.broadcast %262 : vector<16x1xf32> to vector<16x16xf32>
    %264 = arith.mulf %259, %263 : vector<16x16xf32>
    %265 = arith.addf %247, %264 : vector<16x16xf32>
    %cst_102 = arith.constant dense<0.000000e+00> : vector<16x8xf32>
    %266 = tpu.matmul %264, %252, %cst_102 {dimension_numbers = #tpu.dot_dimension_numbers<[1], [0], [0], [1], [0, 0, 1, 1], [], []>} : vector<16x16xf32>, vector<16x8xf32>, vector<16x8xf32> -> vector<16x8xf32>
    %c0_103 = arith.constant 0 : index
    %c24_104 = arith.constant 24 : index
    %267 = vector.load %arg8[%c0_103, %c24_104] : memref<16x32xf32, #tpu.memory_space<vmem>>, vector<16x8xf32>
    tpu.vector_store %arg8[%c0_103, %c24_104], %266 {strides = array<i32>} : memref<16x32xf32, #tpu.memory_space<vmem>>, vector<16x8xf32>,
    %cst_105 = arith.constant 2.500000e-01 : f32
    %268 = vector.broadcast %cst_105 : f32 to vector<16x16xf32>
    %269 = arith.mulf %265, %268 : vector<16x16xf32>
    %c1_106 = arith.constant 1 : index
    %c0_107 = arith.constant 0 : index
    %c0_108 = arith.constant 0 : index
    %270 = vector.load %arg7[%c1_106, %c0_107, %c0_108] : memref<2x16x16xf32, #tpu.memory_space<vmem>>, vector<1x16x16xf32>
    %271 = vector.shape_cast %270 : vector<1x16x16xf32> to vector<16x16xf32>
    %272 = vector.shape_cast %269 : vector<16x16xf32> to vector<1x16x16xf32>
    tpu.vector_store %arg7[%c1_106, %c0_107, %c0_108], %272 {strides = array<i32>} : memref<2x16x16xf32, #tpu.memory_space<vmem>>, vector<1x16x16xf32>,
    %c0_109 = arith.constant 0 : index
    %c0_110 = arith.constant 0 : index
    %273 = vector.load %arg8[%c0_109, %c0_110] : memref<16x32xf32, #tpu.memory_space<vmem>>, vector<16x32xf32>
    %c1_111 = arith.constant 1 : index
    %c0_112 = arith.constant 0 : index
    %c0_113 = arith.constant 0 : index
    %274 = vector.load %arg2[%c1_111, %c0_112, %c0_113] : memref<2x32x32xf32, #tpu.memory_space<vmem>>, vector<1x32x32xf32>
    %275 = vector.shape_cast %274 : vector<1x32x32xf32> to vector<32x32xf32>
    %cst_114 = arith.constant dense<0.000000e+00> : vector<16x32xf32>
    %276 = tpu.matmul %273, %275, %cst_114 {dimension_numbers = #tpu.dot_dimension_numbers<[1], [0], [0], [1], [0, 0, 1, 1], [], []>} : vector<16x32xf32>, vector<32x32xf32>, vector<16x32xf32> -> vector<16x32xf32>
    %c9 = arith.constant 9 : index
    %c0_115 = arith.constant 0 : index
    %277 = vector.load %arg5[%c9, %c0_115] : memref<18x128xf32, #tpu.memory_space<vmem>>, vector<1x32xf32>
    %278 = vector.broadcast %277 : vector<1x32xf32> to vector<16x32xf32>
    %279 = arith.addf %276, %278 : vector<16x32xf32>
    %280 = arith.addf %188, %279 : vector<16x32xf32>
    %c10 = arith.constant 10 : index
    %c0_116 = arith.constant 0 : index
    %281 = vector.load %arg5[%c10, %c0_116] : memref<18x128xf32, #tpu.memory_space<vmem>>, vector<1x32xf32>
    %c11 = arith.constant 11 : index
    %c0_117 = arith.constant 0 : index
    %282 = vector.load %arg5[%c11, %c0_117] : memref<18x128xf32, #tpu.memory_space<vmem>>, vector<1x32xf32>
    %cst_118 = arith.constant dense<0.000000e+00> : vector<16xf32>
    %283 = vector.multi_reduction <add>, %280, %cst_118 [1] : vector<16x32xf32> to vector<16xf32>
    %284 = vector.shape_cast %283 : vector<16xf32> to vector<16x1xf32>
    %cst_119 = arith.constant 3.200000e+01 : f32
    %285 = vector.broadcast %cst_119 : f32 to vector<16x1xf32>
    %286 = arith.divf %284, %285 : vector<16x1xf32>
    %287 = vector.broadcast %286 : vector<16x1xf32> to vector<16x32xf32>
    %288 = arith.subf %280, %287 : vector<16x32xf32>
    %289 = arith.mulf %288, %288 : vector<16x32xf32>
    %cst_120 = arith.constant dense<0.000000e+00> : vector<16xf32>
    %290 = vector.multi_reduction <add>, %289, %cst_120 [1] : vector<16x32xf32> to vector<16xf32>
    %291 = vector.shape_cast %290 : vector<16xf32> to vector<16x1xf32>
    %cst_121 = arith.constant 3.200000e+01 : f32
    %292 = vector.broadcast %cst_121 : f32 to vector<16x1xf32>
    %293 = arith.divf %291, %292 : vector<16x1xf32>
    %cst_122 = arith.constant 9.99999974E-6 : f32
    %294 = vector.broadcast %cst_122 : f32 to vector<16x1xf32>
    %295 = arith.addf %293, %294 : vector<16x1xf32>
    %296 = math.rsqrt %295 : vector<16x1xf32>
    %297 = vector.broadcast %296 : vector<16x1xf32> to vector<16x32xf32>
    %298 = arith.mulf %288, %297 : vector<16x32xf32>
    %299 = vector.broadcast %281 : vector<1x32xf32> to vector<16x32xf32>
    %300 = arith.mulf %298, %299 : vector<16x32xf32>
    %301 = vector.broadcast %282 : vector<1x32xf32> to vector<16x32xf32>
    %302 = arith.addf %300, %301 : vector<16x32xf32>
    %c0_123 = arith.constant 0 : index
    %c64 = arith.constant 64 : index
    %303 = vector.load %arg3[%c0_123, %c64] : memref<32x128xf32, #tpu.memory_space<vmem>>, vector<32x64xf32>
    %cst_124 = arith.constant dense<0.000000e+00> : vector<16x64xf32>
    %304 = tpu.matmul %302, %303, %cst_124 {dimension_numbers = #tpu.dot_dimension_numbers<[1], [0], [0], [1], [0, 0, 1, 1], [], []>} : vector<16x32xf32>, vector<32x64xf32>, vector<16x64xf32> -> vector<16x64xf32>
    %c12 = arith.constant 12 : index
    %c0_125 = arith.constant 0 : index
    %305 = vector.load %arg5[%c12, %c0_125] : memref<18x128xf32, #tpu.memory_space<vmem>>, vector<1x64xf32>
    %306 = vector.broadcast %305 : vector<1x64xf32> to vector<16x64xf32>
    %307 = arith.addf %304, %306 : vector<16x64xf32>
    %cst_126 = arith.constant 0.000000e+00 : f32
    %308 = vector.broadcast %cst_126 : f32 to vector<16x64xf32>
    %309 = arith.maximumf %307, %308 : vector<16x64xf32>
    %c1_127 = arith.constant 1 : index
    %c0_128 = arith.constant 0 : index
    %c0_129 = arith.constant 0 : index
    %310 = vector.load %arg4[%c1_127, %c0_128, %c0_129] : memref<2x64x32xf32, #tpu.memory_space<vmem>>, vector<1x64x32xf32>
    %311 = vector.shape_cast %310 : vector<1x64x32xf32> to vector<64x32xf32>
    %cst_130 = arith.constant dense<0.000000e+00> : vector<16x32xf32>
    %312 = tpu.matmul %309, %311, %cst_130 {dimension_numbers = #tpu.dot_dimension_numbers<[1], [0], [0], [1], [0, 0, 1, 1], [], []>} : vector<16x64xf32>, vector<64x32xf32>, vector<16x32xf32> -> vector<16x32xf32>
    %c13 = arith.constant 13 : index
    %c0_131 = arith.constant 0 : index
    %313 = vector.load %arg5[%c13, %c0_131] : memref<18x128xf32, #tpu.memory_space<vmem>>, vector<1x32xf32>
    %314 = vector.broadcast %313 : vector<1x32xf32> to vector<16x32xf32>
    %315 = arith.addf %312, %314 : vector<16x32xf32>
    %316 = arith.addf %302, %315 : vector<16x32xf32>
    %c14 = arith.constant 14 : index
    %c0_132 = arith.constant 0 : index
    %317 = vector.load %arg5[%c14, %c0_132] : memref<18x128xf32, #tpu.memory_space<vmem>>, vector<1x32xf32>
    %c15 = arith.constant 15 : index
    %c0_133 = arith.constant 0 : index
    %318 = vector.load %arg5[%c15, %c0_133] : memref<18x128xf32, #tpu.memory_space<vmem>>, vector<1x32xf32>
    %cst_134 = arith.constant dense<0.000000e+00> : vector<16xf32>
    %319 = vector.multi_reduction <add>, %316, %cst_134 [1] : vector<16x32xf32> to vector<16xf32>
    %320 = vector.shape_cast %319 : vector<16xf32> to vector<16x1xf32>
    %cst_135 = arith.constant 3.200000e+01 : f32
    %321 = vector.broadcast %cst_135 : f32 to vector<16x1xf32>
    %322 = arith.divf %320, %321 : vector<16x1xf32>
    %323 = vector.broadcast %322 : vector<16x1xf32> to vector<16x32xf32>
    %324 = arith.subf %316, %323 : vector<16x32xf32>
    %325 = arith.mulf %324, %324 : vector<16x32xf32>
    %cst_136 = arith.constant dense<0.000000e+00> : vector<16xf32>
    %326 = vector.multi_reduction <add>, %325, %cst_136 [1] : vector<16x32xf32> to vector<16xf32>
    %327 = vector.shape_cast %326 : vector<16xf32> to vector<16x1xf32>
    %cst_137 = arith.constant 3.200000e+01 : f32
    %328 = vector.broadcast %cst_137 : f32 to vector<16x1xf32>
    %329 = arith.divf %327, %328 : vector<16x1xf32>
    %cst_138 = arith.constant 9.99999974E-6 : f32
    %330 = vector.broadcast %cst_138 : f32 to vector<16x1xf32>
    %331 = arith.addf %329, %330 : vector<16x1xf32>
    %332 = math.rsqrt %331 : vector<16x1xf32>
    %333 = vector.broadcast %332 : vector<16x1xf32> to vector<16x32xf32>
    %334 = arith.mulf %324, %333 : vector<16x32xf32>
    %335 = vector.broadcast %317 : vector<1x32xf32> to vector<16x32xf32>
    %336 = arith.mulf %334, %335 : vector<16x32xf32>
    %337 = vector.broadcast %318 : vector<1x32xf32> to vector<16x32xf32>
    %338 = arith.addf %336, %337 : vector<16x32xf32>
    %c16_139 = arith.constant 16 : index
    %c0_140 = arith.constant 0 : index
    %339 = vector.load %arg5[%c16_139, %c0_140] : memref<18x128xf32, #tpu.memory_space<vmem>>, vector<1x32xf32>
    %c17 = arith.constant 17 : index
    %c0_141 = arith.constant 0 : index
    %340 = vector.load %arg5[%c17, %c0_141] : memref<18x128xf32, #tpu.memory_space<vmem>>, vector<1x32xf32>
    %cst_142 = arith.constant dense<0.000000e+00> : vector<16xf32>
    %341 = vector.multi_reduction <add>, %338, %cst_142 [1] : vector<16x32xf32> to vector<16xf32>
    %342 = vector.shape_cast %341 : vector<16xf32> to vector<16x1xf32>
    %cst_143 = arith.constant 3.200000e+01 : f32
    %343 = vector.broadcast %cst_143 : f32 to vector<16x1xf32>
    %344 = arith.divf %342, %343 : vector<16x1xf32>
    %345 = vector.broadcast %344 : vector<16x1xf32> to vector<16x32xf32>
    %346 = arith.subf %338, %345 : vector<16x32xf32>
    %347 = arith.mulf %346, %346 : vector<16x32xf32>
    %cst_144 = arith.constant dense<0.000000e+00> : vector<16xf32>
    %348 = vector.multi_reduction <add>, %347, %cst_144 [1] : vector<16x32xf32> to vector<16xf32>
    %349 = vector.shape_cast %348 : vector<16xf32> to vector<16x1xf32>
    %cst_145 = arith.constant 3.200000e+01 : f32
    %350 = vector.broadcast %cst_145 : f32 to vector<16x1xf32>
    %351 = arith.divf %349, %350 : vector<16x1xf32>
    %cst_146 = arith.constant 9.99999974E-6 : f32
    %352 = vector.broadcast %cst_146 : f32 to vector<16x1xf32>
    %353 = arith.addf %351, %352 : vector<16x1xf32>
    %354 = math.rsqrt %353 : vector<16x1xf32>
    %355 = vector.broadcast %354 : vector<16x1xf32> to vector<16x32xf32>
    %356 = arith.mulf %346, %355 : vector<16x32xf32>
    %357 = vector.broadcast %339 : vector<1x32xf32> to vector<16x32xf32>
    %358 = arith.mulf %356, %357 : vector<16x32xf32>
    %359 = vector.broadcast %340 : vector<1x32xf32> to vector<16x32xf32>
    %360 = arith.addf %358, %359 : vector<16x32xf32>
    %c0_147 = arith.constant 0 : index
    %c0_148 = arith.constant 0 : index
    %361 = vector.load %arg6[%c0_147, %c0_148] : memref<16x32xf32, #tpu.memory_space<vmem>>, vector<16x32xf32>
    tpu.vector_store %arg6[%c0_147, %c0_148], %360 {strides = array<i32>} : memref<16x32xf32, #tpu.memory_space<vmem>>, vector<16x32xf32>,
    return
  }
}

</mosaic_0001>

<bundles_post_ra>
// kernel: transformer_encoder.1
= control target key start
LH: loop header
LB: loop body
LE: loop exit
PB: predicated region body
PF: predicated region fallthrough
CT: control target
= control target key end

     0   :  { %vm82_vm0 = vcmask 261120   ;;  %s3910_s0 = inlined_call_operand.vmem [shape: f32[16,32], index: 0, kind: input, shape index: {}]   ;;  %s3911_s1 = inlined_call_operand.vmem [shape: f32[2,32,128], index: 1, kind: input, shape index: {}]   ;;  %s3912_s2 = inlined_call_operand.vmem [shape: f32[2,32,32], index: 2, kind: input, shape index: {}]   ;;  %s3913_s3 = inlined_call_operand.vmem [shape: f32[32,128], index: 3, kind: input, shape index: {}]   ;;  %s3914_s4 = inlined_call_operand.vmem [shape: f32[2,64,32], index: 4, kind: input, shape index: {}]   ;;  %s3915_s5 = inlined_call_operand.vmem [shape: f32[18,128], index: 5, kind: input, shape index: {}]   ;;  %s3916_s6 = inlined_call_operand.hbm [shape: f32[16,32], index: 6, kind: output, shape index: {0}]   ;;  %s3917_s7 = inlined_call_operand.vmem [shape: f32[2,16,16], index: 7, kind: output, shape index: {1}]  }
   0x1   :  { %v76_v0 = vld [vmem:[%s3911_s1 + $0x18] sm:$0xff]  ;;  %v75_v1 = vld [vmem:[%s3911_s1 + $0x10] sm:$0xff]  ;;  %v3376_v2 = vld [vmem:[%s3910_s0] sm:$0xff] }
   0x2   :  { %2971 = vmatprep.subr.mxu1 %v76_v0  ;;  %v74_v3 = vld [vmem:[%s3911_s1 + $0x8] sm:$0xff]  ;;  %2979 = vmatprep.mubr.msk.f32.mxu1 %vm82_vm0, %v3376_v2 }
   0x3   :  { %2972 = vmatpush3.msra.mxu1 %v76_v0 }
   0x4   :  { %13 = vsyncpa [#allocation4], 0  ;;  %2973 = vmatprep.subr.mxu1 %v75_v1  ;;  %v73_v4 = vld [vmem:[%s3911_s1] sm:$0xff]  ;;  %v3389_v5 = vld [vmem:[%s3910_s0 + $0x8] sm:$0xff]  ;;  %vm170_vm1 = vcmask 64512   ;;  %s3310_s15 = smov 88   ;;  %v28_v17 = vlaneseq }
   0x5   :  { %2974 = vmatpush3.msra.mxu1 %v75_v1  ;;  %v2751_v6 = vld [vmem:[%s3915_s5] ss:$0 sm:$0xff]  ;;  %s3311_s0 = smov 96   ;;  %s3312_s16 = smov 120   ;;  %v3313_v24 = vmov -1e+30  }
   0x6   :  { %2975 = vmatprep.subr.mxu1 %v74_v3  ;;  %v29_v18 = vshrl.u32 %v28_v17, 7  ;;  %v32_v20 = vand.u32 127, %v28_v17  ;;  %vm254_vm4 = vcmask 130048   ;;  %s3314_s17 = smov 64   ;;  %s3315_s18 = smov 56   ;;  %vm578_vm5 = vcmask 130112  }
   0x7   :  { %2976 = vmatpush3.msra.mxu1 %v74_v3  ;;  %s3316_s19 = smov 80   ;;  %s3317_s20 = smov 112   ;;  %vm791_vm6 = vcmask 195712   ;;  %vm1004_vm7 = vcmask 261312   ;;  %vm1251_vm8 = vcmask 523264  }
   0x8   :  { %2977 = vmatprep.subr.mxu1 %v73_v4  ;;  %v30_v19 = vadd.s32 8, %v29_v18  ;;  %v61_v22 = vand.u32 1, %v32_v20  ;;  %v37_v23 = vand.u32 1, %v29_v18  ;;  %s3318_s21 = smov 48   ;;  %s3319_s22 = smov 72  }
   0x9   :  { %2978 = vmatpush3.msra.mxu1 %v73_v4  ;;  %s3320_s23 = smov 104   ;;  %s3321_s24 = smov 40  }
   0xa   :  { %2980 = vmatmul.mubr.msk.f32.vlgmr.msra.gmra.mxu1 %vm82_vm0, %v3389_v5  ;;  %v44_v21 = vand.u32 1, %v30_v19  ;;  %vm69_vm3 = vcmp.eq.s32.totalorder %v37_v23, %v61_v22  ;;  %s3322_s25 = smov 8   ;;  %s3323_s26 = smov 16  }
   0xb   :  { %v3428_v27 = vsel %vm69_vm3, 0.0, %v3313_v24  ;;  %s3324_s28 = smov 24   ;;  %s3325_s13 = smov [#allocation3]  }
   0xc   :  { %vm70_vm2 = vcmp.eq.s32.totalorder %v44_v21, %v61_v22  ;;  %s2736_s14 = sshll.u32 %s3325_s13, 4  ;;  %s2737_s14 = int_to_ptr.vmem [resolvable:$true] %s2736_s14 }
   0xd   :  { %v3426_v25 = vsel %vm70_vm2, 0.0, %v3313_v24  ;;  %s3288_s27 = scalar_lea.vmem %s2737_s14, 256  ;;  %p3293_p1 = scmp.lt.s32.totalorder %s2737_s14, %s2737_s14 }
   0xe   :  { %p3289_p0 = scmp.ne.s32.totalorder %s2737_s14, %s3288_s27  ;;  %p3294_p2 = scmp.lt.s32.totalorder %s3288_s27, %s3288_s27 }
  0x10   :  { %p3295_p3 = por %p3294_p2, %p3293_p1 }
  0x12   :  { %p3296_p4 = pnand %p3295_p3, %p3289_p0 }
  0xca   :  { %v2981_v7 = vpop.f32.mrf.mxu1 }
  0xcb   :  { %v3396_v8 = vadd.f32 %v2981_v7, %v2751_v6 }
  0xcc   :  { %v155_v9 = vpop.f32.mrf.mxu1 }
  0xcd   :  { %v3398_v10 = vadd.f32 %v2751_v6, %v155_v9  ;;  %374 = vrot.lane.b32.xlu1 %v3396_v8, %s3310_s15  ;;  %168 = vrot.lane.b32.xlu0 %v3396_v8, %s3311_s0 }
  0xcf   :  { %2986 = vmatprep.mubr.msk.f32.mxu1 %vm170_vm1, %v3398_v10 }
  0xd1   :  { %372 = vrot.lane.b32.xlu1 %v3398_v10, %s3310_s15  ;;  %166 = vrot.lane.b32.xlu0 %v3398_v10, %s3311_s0 }
  0xd5   :  { %370 = vrot.lane.b32.xlu1 %v3396_v8, %s3312_s16  ;;  %368 = vrot.lane.b32.xlu0 %v3398_v10, %s3312_s16 }
 0x13f   :  { %v169_v11 = vpop.permute.xlu0 %168  ;;  %v375_v12 = vpop.permute.xlu1 %374 }
 0x140   :  { %2982 = vmatprep.subr.msk.mxu1 %vm170_vm1, %v169_v11 }
 0x141   :  { %2983 = vmatpush3.xpose.msk.msra.mxu1 %vm170_vm1, %v169_v11 }
 0x143   :  { %v167_v13 = vpop.permute.xlu0 %166  ;;  %v373_v15 = vpop.permute.xlu1 %372 }
 0x144   :  { %2984 = vmatprep.subr.msk.mxu1 %vm170_vm1, %v167_v13 }
 0x145   :  { %2985 = vmatpush3.xpose.msk.msra.mxu1 %vm170_vm1, %v167_v13 }
 0x146   :  { %2996 = vmatprep.subr.msk.mxu1 %vm170_vm1, %v375_v12 }
 0x147   :  { %v369_v14 = vpop.permute.xlu0 %368  ;;  %v371_v16 = vpop.permute.xlu1 %370 }
 0x148   :  { %2987 = vmatmul.mubr.msk.f32.vlgmr.msra.gmra.mxu1 %vm170_vm1, %v3396_v8 }
 0x149   :  { %2997 = vmatpush3.xpose.msk.msra.mxu1 %vm170_vm1, %v375_v12  ;;  %3000 = vmatprep.mubr.msk.f32.mxu1 %vm170_vm1, %v369_v14 }
 0x14a   :  { %2998 = vmatprep.subr.msk.mxu1 %vm170_vm1, %v373_v15 }
 0x14d   :  { %2999 = vmatpush3.xpose.msk.msra.mxu1 %vm170_vm1, %v373_v15 }
 0x150   :  { %3001 = vmatmul.mubr.msk.f32.vlgmr.msra.gmra.mxu1 %vm170_vm1, %v371_v16 }
 0x208   :  { %v2988_v26 = vpop.f32.mrf.mxu1 }
 0x209   :  { %v251_v28 = vadd.f32 %v2988_v26, %v3426_v25 }
 0x20a   :  { %v245_v29 = vpop.f32.mrf.mxu1 }
 0x20b   :  { %v246_v30 = vadd.f32 %v245_v29, %v3428_v27  ;;  %v258_v31 = vsel %vm254_vm4, %v251_v28, -inf }
 0x20c   :  { %259 = vmax.xlane.f32.xlu1 %v258_v31 }
 0x20d   :  { %v255_v32 = vsel %vm254_vm4, %v246_v30, -inf }
 0x20e   :  { %256 = vmax.xlane.f32.xlu0 %v255_v32 }
 0x210   :  { %v3002_v33 = vpop.f32.mrf.mxu1 }
 0x211   :  { %v456_v36 = vadd.f32 %v3002_v33, %v3426_v25 }
 0x212   :  { %v450_v34 = vpop.f32.mrf.mxu1 }
 0x213   :  { %v451_v35 = vadd.f32 %v450_v34, %v3428_v27  ;;  %v462_v38 = vsel %vm254_vm4, %v456_v36, -inf }
 0x215   :  { %v459_v37 = vsel %vm254_vm4, %v451_v35, -inf }
 0x216   :  { %460 = vmax.xlane.f32.xlu0 %v459_v37 }
 0x21a   :  { %463 = vmax.xlane.f32.xlu0 %v462_v38 }
 0x21d   :  { %281 = vrot.lane.b32.xlu1 %v3396_v8, %s3314_s17 }
 0x221   :  { %485 = vrot.lane.b32.xlu1 %v3396_v8, %s3315_s18 }
 0x225   :  { %483 = vrot.lane.b32.xlu1 %v3398_v10, %s3315_s18 }
 0x230   :  { %279 = vrot.lane.b32.xlu0 %v3398_v10, %s3314_s17 }
 0x295   :  { %v260_v39 = vpop.xlane.xlu1 %259 }
 0x296   :  { %v262_v40 = vsub.f32 %v251_v28, %v260_v39 }
 0x297   :  { %v257_v41 = vpop.xlane.xlu0 %256 }
 0x298   :  { %v265_v42 = vmul.f32 1.442695, %v262_v40  ;;  %v261_v43 = vsub.f32 %v246_v30, %v257_v41 }
 0x299   :  { %v282_v44 = vpop.permute.xlu1 %281 }
 0x29a   :  { %3204 = vpow2.f32 %v265_v42  ;;  %v263_v45 = vmul.f32 1.442695, %v261_v43  ;;  %2989 = vmatprep.subr.mxu0 %v282_v44 }
 0x29b   :  { %2990 = vmatpush3.msra.mxu0 %v282_v44 }
 0x29c   :  { %3206 = vpow2.f32 %v263_v45 }
 0x29d   :  { %v486_v54 = vpop.permute.xlu1 %485 }
 0x29f   :  { %v461_v46 = vpop.xlane.xlu0 %460 }
 0x2a0   :  { %v465_v58 = vsub.f32 %v451_v35, %v461_v46 }
 0x2a1   :  { %v484_v62 = vpop.permute.xlu1 %483 }
 0x2a2   :  { %v467_v59 = vmul.f32 1.442695, %v465_v58 }
 0x2a3   :  { %v464_v47 = vpop.xlane.xlu0 %463 }
 0x2a4   :  { %v466_v48 = vsub.f32 %v456_v36, %v464_v47 }
 0x2a6   :  { %v469_v49 = vmul.f32 1.442695, %v466_v48 }
 0x2a7   :  { %v3205_v50 = vpop.eup %3204  ;;  %v280_v51 = vpop.permute.xlu0 %279 }
 0x2a8   :  { %3208 = vpow2.f32 %v469_v49  ;;  %2991 = vmatprep.subr.mxu0 %v280_v51  ;;  %v270_v52 = vsel %vm254_vm4, %v3205_v50, 0.0 }
 0x2a9   :  { %v3207_v53 = vpop.eup %3206  ;;  %271 = vadd.xlane.f32.xlu0 %v270_v52  ;;  %2992 = vmatpush3.msra.mxu0 %v280_v51  ;;  %3210 = vpow2.f32 %v467_v59 }
 0x2aa   :  { %3003 = vmatprep.subr.mxu0 %v486_v54  ;;  %v267_v55 = vsel %vm254_vm4, %v3207_v53, 0.0 }
 0x2ab   :  { %268 = vadd.xlane.f32.xlu1 %v267_v55 }
 0x2b5   :  { %v3209_v56 = vpop.eup %3208 }
 0x2b6   :  { %v474_v57 = vsel %vm254_vm4, %v3209_v56, 0.0  ;;  %v3211_v60 = vpop.eup %3210 }
 0x2b7   :  { %475 = vadd.xlane.f32.xlu0 %v474_v57  ;;  %v471_v61 = vsel %vm254_vm4, %v3211_v60, 0.0 }
 0x2bc   :  { %585 = vrot.lane.b32.xlu1 %v3398_v10, %s3316_s19 }
 0x2cd   :  { %587 = vrot.lane.b32.xlu0 %v3396_v8, %s3316_s19 }
 0x2d1   :  { %581 = vrot.lane.b32.xlu0 %v3398_v10, %s3317_s20 }
 0x2e0   :  { %472 = vadd.xlane.f32.xlu1 %v471_v61 }
 0x2f1   :  { %583 = vrot.lane.b32.xlu1 %v3396_v8, %s3317_s20 }
 0x332   :  { %v272_v63 = vpop.xlane.xlu0 %271 }
 0x333   :  { %3212 = vrcp.f32 %v272_v63 }
 0x334   :  { %v269_v0 = vpop.xlane.xlu1 %268 }
 0x335   :  { %3214 = vrcp.f32 %v269_v0 }
 0x338   :  { %v586_v14 = vpop.permute.xlu1 %585 }
 0x340   :  { %v476_v1 = vpop.xlane.xlu0 %475  ;;  %v3213_v3 = vpop.eup %3212 }
 0x341   :  { %3216 = vrcp.f32 %v476_v1  ;;  %v276_v7 = vmul.f32 %v3213_v3, %v3205_v50 }
 0x342   :  { %v3215_v4 = vpop.eup %3214 }
 0x343   :  { %v275_v6 = vmul.f32 %v3215_v4, %v3207_v53 }
 0x344   :  { %v588_v9 = vpop.permute.xlu0 %587 }
 0x345   :  { %2993 = vmatprep.mubr.msk.f32.mxu0 %vm254_vm4, %v275_v6 }
 0x346   :  { %2994 = vmatmul.mubr.msk.f32.vlgmr.msra.gmra.mxu0 %vm254_vm4, %v276_v7 }
 0x347   :  { %3004 = vmatpush3.msra.mxu0 %v486_v54 }
 0x348   :  { %3005 = vmatprep.subr.mxu0 %v484_v62  ;;  %v582_v19 = vpop.permute.xlu0 %581 }
 0x349   :  { %3006 = vmatpush3.msra.mxu0 %v484_v62 }
 0x34a   :  { %3010 = vmatprep.subr.msk.mxu0 %vm170_vm1, %v588_v9 }
 0x34e   :  { %v3217_v11 = vpop.eup %3216 }
 0x34f   :  { %v480_v12 = vmul.f32 %v3217_v11, %v3209_v56 }
 0x351   :  { %v3461_v13 = vadd.f32 %v480_v12, %v276_v7 }
 0x369   :  { %v473_v15 = vpop.xlane.xlu1 %472 }
 0x36a   :  { %3218 = vrcp.f32 %v473_v15 }
 0x36d   :  { %v584_v20 = vpop.permute.xlu1 %583 }
 0x377   :  { %v3219_v16 = vpop.eup %3218 }
 0x378   :  { %v479_v17 = vmul.f32 %v3219_v16, %v3211_v60 }
 0x37a   :  { %v3463_v18 = vadd.f32 %v479_v17, %v275_v6  ;;  %3007 = vmatprep.mubr.msk.f32.mxu0 %vm254_vm4, %v479_v17 }
 0x37b   :  { %3008 = vmatmul.mubr.msk.f32.vlgmr.msra.gmra.mxu0 %vm254_vm4, %v480_v12 }
 0x37c   :  { %3011 = vmatpush3.xpose.msk.msra.mxu0 %vm170_vm1, %v588_v9  ;;  %3014 = vmatprep.mubr.msk.f32.mxu0 %vm170_vm1, %v582_v19 }
 0x37d   :  { %3012 = vmatprep.subr.msk.mxu0 %vm170_vm1, %v586_v14 }
 0x380   :  { %3013 = vmatpush3.xpose.msk.msra.mxu0 %vm170_vm1, %v586_v14 }
 0x383   :  { %3015 = vmatmul.mubr.msk.f32.vlgmr.msra.gmra.mxu0 %vm170_vm1, %v584_v20 }
 0x406   :  { %v2995_v21 = vpop.f32.mrf.mxu0 }
 0x407   :  { %367 = vst.msk [vmem:[#allocation2 + $0x8] sm:$0xff] %vm170_vm1, %v2995_v21 }
 0x408   :  { %v357_v22 = vpop.f32.mrf.mxu0 }
 0x409   :  { %366 = vst.msk [vmem:[#allocation2] sm:$0xff] %vm170_vm1, %v357_v22 }
 0x43b   :  { %v3474_v23 = vpop.f32.mrf.mxu0 }
 0x43d   :  { %v3476_v24 = vpop.f32.mrf.mxu0 }
 0x443   :  { %v3016_v26 = vpop.f32.mrf.mxu0 }
 0x444   :  { %v669_v28 = vadd.f32 %v3016_v26, %v3426_v25 }
 0x445   :  { %v663_v29 = vpop.f32.mrf.mxu0 }
 0x446   :  { %v664_v30 = vadd.f32 %v663_v29, %v3428_v27  ;;  %v675_v31 = vsel %vm254_vm4, %v669_v28, -inf }
 0x447   :  { %676 = vmax.xlane.f32.xlu1 %v675_v31  ;;  %v1016_v31 = vld [vmem:[%s3912_s2 + $0x18] sm:$0xff] }
 0x448   :  { %v672_v32 = vsel %vm254_vm4, %v664_v30, -inf }
 0x449   :  { %673 = vmax.xlane.f32.xlu0 %v672_v32  ;;  %v1015_v32 = vld [vmem:[%s3912_s2 + $0x10] sm:$0xff] }
 0x458   :  { %698 = vrot.lane.b32.xlu1 %v3396_v8, %s3318_s21 }
 0x45c   :  { %800 = vrot.lane.b32.xlu1 %v3396_v8, %s3319_s22 }
 0x460   :  { %798 = vrot.lane.b32.xlu1 %v3398_v10, %s3319_s22 }
 0x464   :  { %796 = vrot.lane.b32.xlu1 %v3396_v8, %s3320_s23 }
 0x4d0   :  { %v677_v33 = vpop.xlane.xlu1 %676 }
 0x4d1   :  { %v679_v34 = vsub.f32 %v669_v28, %v677_v33  ;;  %v1014_v33 = vld [vmem:[%s3912_s2 + $0x8] sm:$0xff] }
 0x4d2   :  { %v674_v35 = vpop.xlane.xlu0 %673 }
 0x4d3   :  { %v682_v36 = vmul.f32 1.442695, %v679_v34  ;;  %v678_v37 = vsub.f32 %v664_v30, %v674_v35  ;;  %v1013_v34 = vld [vmem:[%s3912_s2] sm:$0xff] }
 0x4d4   :  { %v699_v38 = vpop.permute.xlu1 %698 }
 0x4d5   :  { %3220 = vpow2.f32 %v682_v36  ;;  %v680_v39 = vmul.f32 1.442695, %v678_v37  ;;  %3017 = vmatprep.subr.mxu1 %v699_v38 }
 0x4d6   :  { %3018 = vmatpush3.msra.mxu1 %v699_v38 }
 0x4d7   :  { %3222 = vpow2.f32 %v680_v39 }
 0x4d8   :  { %v801_v47 = vpop.permute.xlu1 %800 }
 0x4dc   :  { %v799_v55 = vpop.permute.xlu1 %798 }
 0x4e0   :  { %v797_v56 = vpop.permute.xlu1 %796 }
 0x4e2   :  { %v3221_v40 = vpop.eup %3220 }
 0x4e3   :  { %v687_v41 = vsel %vm254_vm4, %v3221_v40, 0.0 }
 0x4e4   :  { %v3223_v42 = vpop.eup %3222  ;;  %688 = vadd.xlane.f32.xlu0 %v687_v41  ;;  %v2778_v41 = vld [vmem:[%s3915_s5 + $0x1] ss:$0 sm:$0xff] }
 0x4e5   :  { %v684_v43 = vsel %vm254_vm4, %v3223_v42, 0.0 }
 0x4e8   :  { %685 = vadd.xlane.f32.xlu0 %v684_v43 }
 0x4fe   :  { %696 = vrot.lane.b32.xlu0 %v3398_v10, %s3318_s21 }
 0x502   :  { %794 = vrot.lane.b32.xlu0 %v3398_v10, %s3320_s23 }
 0x56d   :  { %v689_v44 = vpop.xlane.xlu0 %688 }
 0x56e   :  { %3224 = vrcp.f32 %v689_v44 }
 0x571   :  { %v686_v45 = vpop.xlane.xlu0 %685 }
 0x572   :  { %3226 = vrcp.f32 %v686_v45 }
 0x575   :  { %v697_v46 = vpop.permute.xlu0 %696 }
 0x576   :  { %3019 = vmatprep.subr.mxu1 %v697_v46 }
 0x577   :  { %3020 = vmatpush3.msra.mxu1 %v697_v46 }
 0x578   :  { %3024 = vmatprep.subr.msk.mxu1 %vm170_vm1, %v801_v47 }
 0x579   :  { %v795_v54 = vpop.permute.xlu0 %794 }
 0x57b   :  { %v3225_v48 = vpop.eup %3224 }
 0x57c   :  { %v693_v49 = vmul.f32 %v3225_v48, %v3221_v40 }
 0x57e   :  { %v3498_v50 = vadd.f32 %v693_v49, %v3461_v13 }
 0x57f   :  { %v3227_v51 = vpop.eup %3226 }
 0x580   :  { %v692_v52 = vmul.f32 %v3227_v51, %v3223_v42 }
 0x582   :  { %v3501_v53 = vadd.f32 %v692_v52, %v3463_v18  ;;  %3021 = vmatprep.mubr.msk.f32.mxu1 %vm254_vm4, %v692_v52 }
 0x583   :  { %3022 = vmatmul.mubr.msk.f32.vlgmr.msra.gmra.mxu1 %vm254_vm4, %v693_v49 }
 0x584   :  { %3025 = vmatpush3.xpose.msk.msra.mxu1 %vm170_vm1, %v801_v47  ;;  %3028 = vmatprep.mubr.msk.f32.mxu1 %vm170_vm1, %v795_v54 }
 0x585   :  { %3026 = vmatprep.subr.msk.mxu1 %vm170_vm1, %v799_v55 }
 0x588   :  { %3027 = vmatpush3.xpose.msk.msra.mxu1 %vm170_vm1, %v799_v55 }
 0x58b   :  { %3029 = vmatmul.mubr.msk.f32.vlgmr.msra.gmra.mxu1 %vm170_vm1, %v797_v56 }
 0x643   :  { %v3023_v57 = vpop.f32.mrf.mxu1 }
 0x645   :  { %v774_v58 = vpop.f32.mrf.mxu1 }
 0x64b   :  { %v3030_v59 = vpop.f32.mrf.mxu1 }
 0x64c   :  { %v882_v60 = vadd.f32 %v3030_v59, %v3426_v25  ;;  %v3577_v59 = vld [vmem:[%s3913_s3 + $0x10] sm:$0xff] }
 0x64d   :  { %v876_v61 = vpop.f32.mrf.mxu1 }
 0x64e   :  { %v877_v62 = vadd.f32 %v876_v61, %v3428_v27  ;;  %v888_v63 = vsel %vm254_vm4, %v882_v60, -inf  ;;  %v3593_v61 = vld [vmem:[%s3913_s3] sm:$0xff] }
 0x64f   :  { %889 = vmax.xlane.f32.xlu1 %v888_v63  ;;  %v1244_v63 = vld [vmem:[%s3914_s4 + $0x30] sm:$0xff] }
 0x650   :  { %v885_v0 = vsel %vm254_vm4, %v877_v62, -inf }
 0x651   :  { %886 = vmax.xlane.f32.xlu0 %v885_v0  ;;  %v1243_v0 = vld [vmem:[%s3914_s4 + $0x28] sm:$0xff] }
 0x660   :  { %911 = vrot.lane.b32.xlu1 %v3396_v8, %s3321_s24 }
 0x664   :  { %572 = vrot.lane.b32.xlu1 %v3476_v24, %s3322_s25 }
 0x668   :  { %574 = vrot.lane.b32.xlu1 %v3474_v23, %s3322_s25 }
 0x66c   :  { %787 = vrot.lane.b32.xlu1 %v3023_v57, %s3323_s26 }
 0x6d8   :  { %v890_v1 = vpop.xlane.xlu1 %889 }
 0x6d9   :  { %v892_v3 = vsub.f32 %v882_v60, %v890_v1  ;;  %v3584_v60 = vld [vmem:[%s3913_s3 + $0x8] sm:$0xff]  ;;  %v1242_v1 = vld [vmem:[%s3914_s4 + $0x20] sm:$0xff] }
 0x6da   :  { %v887_v4 = vpop.xlane.xlu0 %886 }
 0x6db   :  { %v895_v6 = vmul.f32 1.442695, %v892_v3  ;;  %v891_v7 = vsub.f32 %v877_v62, %v887_v4  ;;  %v1245_v62 = vld [vmem:[%s3914_s4 + $0x38] sm:$0xff] }
 0x6dc   :  { %v912_v9 = vpop.permute.xlu1 %911 }
 0x6dd   :  { %3228 = vpow2.f32 %v895_v6  ;;  %v893_v11 = vmul.f32 1.442695, %v891_v7  ;;  %3031 = vmatprep.subr.mxu0 %v912_v9 }
 0x6de   :  { %3032 = vmatpush3.msra.mxu0 %v912_v9 }
 0x6df   :  { %3230 = vpow2.f32 %v893_v11 }
 0x6e0   :  { %v573_v8 = vpop.permute.xlu1 %572 }
 0x6e1   :  { %579 = vst.msk [vmem:[#allocation2] sm:$0xff] %vm578_vm5, %v573_v8 }
 0x6e4   :  { %v575_v12 = vpop.permute.xlu1 %574 }
 0x6e5   :  { %580 = vst.msk [vmem:[#allocation2 + $0x8] sm:$0xff] %vm578_vm5, %v575_v12  ;;  %v2781_v12 = vld [vmem:[%s3915_s5 + $0x2] ss:$0 sm:$0xff] }
 0x6e8   :  { %v788_v13 = vpop.permute.xlu1 %787 }
 0x6e9   :  { %793 = vst.msk [vmem:[#allocation2 + $0x8] sm:$0xff] %vm791_vm6, %v788_v13 }
 0x6ea   :  { %v3229_v14 = vpop.eup %3228 }
 0x6eb   :  { %v900_v15 = vsel %vm254_vm4, %v3229_v14, 0.0 }
 0x6ec   :  { %v3231_v16 = vpop.eup %3230  ;;  %901 = vadd.xlane.f32.xlu0 %v900_v15 }
 0x6ed   :  { %v897_v17 = vsel %vm254_vm4, %v3231_v16, 0.0 }
 0x6f0   :  { %898 = vadd.xlane.f32.xlu0 %v897_v17 }
 0x706   :  { %909 = vrot.lane.b32.xlu0 %v3398_v10, %s3321_s24 }
 0x70a   :  { %785 = vrot.lane.b32.xlu0 %v774_v58, %s3323_s26 }
 0x775   :  { %v902_v18 = vpop.xlane.xlu0 %901 }
 0x776   :  { %3232 = vrcp.f32 %v902_v18 }
 0x779   :  { %v899_v19 = vpop.xlane.xlu0 %898 }
 0x77a   :  { %3234 = vrcp.f32 %v899_v19 }
 0x77d   :  { %v910_v20 = vpop.permute.xlu0 %909 }
 0x77e   :  { %3033 = vmatprep.subr.mxu0 %v910_v20 }
 0x77f   :  { %3034 = vmatpush3.msra.mxu0 %v910_v20 }
 0x780   :  { %3038 = vmatprep.subr.mxu0 %v1016_v31 }
 0x781   :  { %v786_v21 = vpop.permute.xlu0 %785 }
 0x782   :  { %792 = vst.msk [vmem:[#allocation2] sm:$0xff] %vm791_vm6, %v786_v21  ;;  %v1241_v21 = vld [vmem:[%s3914_s4 + $0x18] sm:$0xff] }
 0x783   :  { %v3233_v22 = vpop.eup %3232 }
 0x784   :  { %v906_v23 = vmul.f32 %v3233_v22, %v3229_v14  ;;  %v2782_v14 = vld [vmem:[%s3915_s5 + $0x3] ss:$0 sm:$0xff]  ;;  %v1240_v22 = vld [vmem:[%s3914_s4 + $0x10] sm:$0xff] }
 0x786   :  { %v908_v24 = vadd.f32 %v906_v23, %v3498_v50 }
 0x787   :  { %v3235_v26 = vpop.eup %3234 }
 0x788   :  { %v905_v28 = vmul.f32 %v3235_v26, %v3231_v16  ;;  %v1008_v29 = vmul.f32 0.25, %v908_v24  ;;  %v1238_v24 = vld [vmem:[%s3914_s4] sm:$0xff] }
 0x789   :  { %v2783_v26 = vld [vmem:[%s3915_s5 + $0x4] ss:$0 sm:$0xff] }
 0x78a   :  { %v907_v10 = vadd.f32 %v905_v28, %v3501_v53  ;;  %3035 = vmatprep.mubr.msk.f32.mxu0 %vm254_vm4, %v905_v28  ;;  %1010 = vst.msk [vmem:[%s3917_s7 + $0x8] sm:$0xff] %vm254_vm4, %v1008_v29 }
 0x78b   :  { %3036 = vmatmul.mubr.msk.f32.vlgmr.msra.gmra.mxu0 %vm254_vm4, %v906_v23  ;;  %v1239_v23 = vld [vmem:[%s3914_s4 + $0x8] sm:$0xff] }
 0x78c   :  { %v1007_v30 = vmul.f32 0.25, %v907_v10  ;;  %3039 = vmatpush3.msra.mxu0 %v1016_v31 }
 0x78d   :  { %3040 = vmatprep.subr.mxu0 %v1015_v32 }
 0x78e   :  { %1009 = vst.msk [vmem:[%s3917_s7] sm:$0xff] %vm254_vm4, %v1007_v30  ;;  %3041 = vmatpush3.msra.mxu0 %v1015_v32 }
 0x78f   :  { %3042 = vmatprep.subr.mxu0 %v1014_v33 }
 0x790   :  { %3043 = vmatpush3.msra.mxu0 %v1014_v33  ;;  %v2786_v33 = vld [vmem:[%s3915_s5 + $0x5] ss:$0 sm:$0xff] }
 0x791   :  { %3044 = vmatprep.subr.mxu0 %v1013_v34 }
 0x792   :  { %3045 = vmatpush3.msra.mxu0 %v1013_v34 }
 0x793   :  { %3060 = vmatprep.subr.mxu0 %v1245_v62 }
 0x84b   :  { %v3037_v35 = vpop.f32.mrf.mxu0 }
 0x84c   :  { %1000 = vrot.lane.b32.xlu1 %v3037_v35, %s3324_s28 }
 0x84d   :  { %v987_v36 = vpop.f32.mrf.mxu0 }
 0x84e   :  { %998 = vrot.lane.b32.xlu0 %v987_v36, %s3324_s28 }
 0x8be   :  { %v1001_v37 = vpop.permute.xlu1 %1000 }
 0x8bf   :  { %1006 = vst.msk [vmem:[#allocation2 + $0x8] sm:$0xff] %vm1004_vm7, %v1001_v37 }
 0x8c0   :  { %v999_v38 = vpop.permute.xlu0 %998 }
 0x8c1   :  { %1005 = vst.msk [vmem:[#allocation2] sm:$0xff] %vm1004_vm7, %v999_v38 }
 0x8c6   :  { %v1012_v40 = vld [vmem:[#allocation2 + $0x8] sm:$0xff] }
 0x8c8   :  { %v1011_v39 = vld [vmem:[#allocation2] sm:$0xff] }
 0x8c9   :  { %3046 = vmatprep.mubr.msk.f32.mxu0 %vm82_vm0, %v1011_v39 }
 0x8ca   :  { %3047 = vmatmul.mubr.msk.f32.vlgmr.msra.gmra.mxu0 %vm82_vm0, %v1012_v40 }
 0x8cb   :  { %3061 = vmatpush3.msra.mxu0 %v1245_v62 }
 0x8cc   :  { %3062 = vmatprep.subr.mxu0 %v1244_v63 }
 0x8cd   :  { %3063 = vmatpush3.msra.mxu0 %v1244_v63 }
 0x8ce   :  { %3064 = vmatprep.subr.mxu0 %v1243_v0 }
 0x8cf   :  { %3065 = vmatpush3.msra.mxu0 %v1243_v0 }
 0x8d0   :  { %3066 = vmatprep.subr.mxu0 %v1242_v1 }
 0x8d1   :  { %3067 = vmatpush3.msra.mxu0 %v1242_v1  ;;  %v2789_v1 = vld [vmem:[%s3915_s5 + $0x6] ss:$0 sm:$0xff] }
 0x8d2   :  { %3068 = vmatprep.subr.mxu0 %v1241_v21 }
 0x8d3   :  { %3069 = vmatpush3.msra.mxu0 %v1241_v21 }
 0x8d4   :  { %3070 = vmatprep.subr.mxu0 %v1240_v22 }
 0x8d5   :  { %3071 = vmatpush3.msra.mxu0 %v1240_v22 }
 0x8d6   :  { %3072 = vmatprep.subr.mxu0 %v1239_v23 }
 0x8d7   :  { %3073 = vmatpush3.msra.mxu0 %v1239_v23 }
 0x8d8   :  { %3074 = vmatprep.subr.mxu0 %v1238_v24 }
 0x8d9   :  { %3075 = vmatpush3.msra.mxu0 %v1238_v24 }
 0x98a   :  { %v3048_v42 = vpop.f32.mrf.mxu0 }
 0x98b   :  { %v1100_v43 = vadd.f32 %v3048_v42, %v2778_v41 }
 0x98c   :  { %v1094_v44 = vpop.f32.mrf.mxu0 }
 0x98d   :  { %v1095_v45 = vadd.f32 %v2778_v41, %v1094_v44  ;;  %v1104_v46 = vadd.f32 %v1100_v43, %v3389_v5 }
 0x98f   :  { %v1110_v47 = vsel %vm82_vm0, %v1104_v46, 0.0  ;;  %v1103_v48 = vadd.f32 %v1095_v45, %v3376_v2  ;;  %v3572_v2 = vld [vmem:[%s3913_s3 + $0x18] sm:$0xff] }
 0x990   :  { %1111 = vadd.xlane.f32.xlu1 %v1110_v47  ;;  %3049 = vmatprep.subr.mxu1 %v3572_v2 }
 0x991   :  { %v1107_v49 = vsel %vm82_vm0, %v1103_v48, 0.0  ;;  %3050 = vmatpush3.msra.mxu1 %v3572_v2 }
 0x992   :  { %1108 = vadd.xlane.f32.xlu0 %v1107_v49  ;;  %3051 = vmatprep.subr.mxu1 %v3577_v59 }
 0x993   :  { %3052 = vmatpush3.msra.mxu1 %v3577_v59 }
 0x994   :  { %3053 = vmatprep.subr.mxu1 %v3584_v60 }
 0x995   :  { %3054 = vmatpush3.msra.mxu1 %v3584_v60 }
 0x996   :  { %3055 = vmatprep.subr.mxu1 %v3593_v61 }
 0x997   :  { %3056 = vmatpush3.msra.mxu1 %v3593_v61 }
 0xa19   :  { %v1112_v50 = vpop.xlane.xlu1 %1111 }
 0xa1a   :  { %v1115_v51 = vmul.f32 0.03125, %v1112_v50 }
 0xa1b   :  { %v1109_v52 = vpop.xlane.xlu0 %1108 }
 0xa1c   :  { %v1114_v53 = vmul.f32 0.03125, %v1109_v52  ;;  %v1117_v54 = vsub.f32 %v1104_v46, %v1115_v51  ;;  %v2794_v52 = vld [vmem:[%s3911_s1 + $0x38] sm:$0xff] }
 0xa1d   :  { %3079 = vmatprep.subr.mxu1 %v2794_v52 }
 0xa1e   :  { %v1116_v55 = vsub.f32 %v1103_v48, %v1114_v53  ;;  %v1119_v58 = vmul.f32 %v1117_v54, %v1117_v54  ;;  %v2793_v53 = vld [vmem:[%s3911_s1 + $0x30] sm:$0xff] }
 0xa20   :  { %v1118_v56 = vmul.f32 %v1116_v55, %v1116_v55  ;;  %v1123_v5 = vsel %vm82_vm0, %v1119_v58, 0.0 }
 0xa22   :  { %v1120_v57 = vsel %vm82_vm0, %v1118_v56, 0.0 }
 0xa23   :  { %1121 = vadd.xlane.f32.xlu0 %v1120_v57 }
 0xa27   :  { %1124 = vadd.xlane.f32.xlu0 %v1123_v5 }
 0xaac   :  { %v1122_v3 = vpop.xlane.xlu0 %1121 }
 0xaad   :  { %v1126_v4 = vmul.f32 0.03125, %v1122_v3 }
 0xaaf   :  { %v1128_v6 = vadd.f32 1e-05, %v1126_v4 }
 0xab0   :  { %v1125_v7 = vpop.xlane.xlu0 %1124 }
 0xab1   :  { %3236 = vrsqrt.f32 %v1128_v6  ;;  %v1127_v9 = vmul.f32 0.03125, %v1125_v7 }
 0xab3   :  { %v1129_v11 = vadd.f32 1e-05, %v1127_v9  ;;  %v2790_v9 = vld [vmem:[%s3915_s5 + $0x7] ss:$0 sm:$0xff] }
 0xab5   :  { %3238 = vrsqrt.f32 %v1129_v11 }
 0xabe   :  { %v3237_v8 = vpop.eup %3236 }
 0xabf   :  { %v1132_v13 = vmul.f32 %v3237_v8, %v1116_v55  ;;  %v2791_v55 = vld [vmem:[%s3911_s1 + $0x20] sm:$0xff] }
 0xac1   :  { %v1138_v15 = vmul.f32 %v2781_v12, %v1132_v13  ;;  %v2795_v13 = vld [vmem:[%s3915_s5 + $0x8] ss:$0 sm:$0xff] }
 0xac2   :  { %v3239_v16 = vpop.eup %3238 }
 0xac3   :  { %v1133_v17 = vmul.f32 %v3239_v16, %v1117_v54  ;;  %v1144_v18 = vadd.f32 %v2782_v14, %v1138_v15  ;;  %v2792_v54 = vld [vmem:[%s3911_s1 + $0x28] sm:$0xff] }
 0xac5   :  { %v1139_v19 = vmul.f32 %v2781_v12, %v1133_v17  ;;  %3057 = vmatprep.mubr.msk.f32.mxu1 %vm82_vm0, %v1144_v18 }
 0xac7   :  { %v1145_v20 = vadd.f32 %v2782_v14, %v1139_v19 }
 0xac9   :  { %3058 = vmatmul.mubr.msk.f32.vlgmr.msra.gmra.mxu1 %vm82_vm0, %v1145_v20 }
 0xaca   :  { %3080 = vmatpush3.msra.mxu1 %v2794_v52 }
 0xacb   :  { %3081 = vmatprep.subr.mxu1 %v2793_v53 }
 0xacc   :  { %3082 = vmatpush3.msra.mxu1 %v2793_v53 }
 0xacd   :  { %3083 = vmatprep.subr.mxu1 %v2792_v54 }
 0xace   :  { %3084 = vmatpush3.msra.mxu1 %v2792_v54 }
 0xacf   :  { %3085 = vmatprep.subr.mxu1 %v2791_v55 }
 0xad0   :  { %3086 = vmatpush3.msra.mxu1 %v2791_v55 }
 0xb89   :  { %v3059_v28 = vpop.f32.mrf.mxu1 }
 0xb8a   :  { %v1233_v29 = vadd.f32 %v3059_v28, %v2783_v26 }
 0xb8b   :  { %v1227_v10 = vpop.f32.mrf.mxu1 }
 0xb8c   :  { %v1228_v30 = vadd.f32 %v2783_v26, %v1227_v10  ;;  %v1237_v32 = vmax.f32 %v1233_v29, 0.0 }
 0xb8e   :  { %v1236_v31 = vmax.f32 %v1228_v30, 0.0 }
 0xb90   :  { %3076 = vmatprep.mubr.msk.f32.mxu0 %vm1251_vm8, %v1236_v31 }
 0xb91   :  { %3077 = vmatmul.mubr.msk.f32.vlgmr.msra.gmra.mxu0 %vm1251_vm8, %v1237_v32 }
 0xc51   :  { %v3078_v34 = vpop.f32.mrf.mxu0 }
 0xc52   :  { %v1330_v35 = vadd.f32 %v3078_v34, %v2786_v33 }
 0xc53   :  { %v1324_v36 = vpop.f32.mrf.mxu0 }
 0xc54   :  { %v1325_v37 = vadd.f32 %v2786_v33, %v1324_v36  ;;  %v1334_v38 = vadd.f32 %v1330_v35, %v1145_v20 }
 0xc56   :  { %v1340_v39 = vsel %vm82_vm0, %v1334_v38, 0.0  ;;  %v1333_v40 = vadd.f32 %v1325_v37, %v1144_v18 }
 0xc57   :  { %1341 = vadd.xlane.f32.xlu0 %v1340_v39 }
 0xc58   :  { %v1337_v41 = vsel %vm82_vm0, %v1333_v40, 0.0 }
 0xc59   :  { %1338 = vadd.xlane.f32.xlu1 %v1337_v41 }
 0xce0   :  { %v1342_v42 = vpop.xlane.xlu0 %1341 }
 0xce1   :  { %v1344_v43 = vmul.f32 0.03125, %v1342_v42 }
 0xce2   :  { %v1339_v44 = vpop.xlane.xlu1 %1338 }
 0xce3   :  { %v1346_v45 = vsub.f32 %v1334_v38, %v1344_v43  ;;  %v1343_v46 = vmul.f32 0.03125, %v1339_v44 }
 0xce5   :  { %v1345_v47 = vsub.f32 %v1333_v40, %v1343_v46  ;;  %v1348_v48 = vmul.f32 %v1346_v45, %v1346_v45 }
 0xce7   :  { %v1352_v49 = vsel %vm82_vm0, %v1348_v48, 0.0  ;;  %v1347_v50 = vmul.f32 %v1345_v47, %v1345_v47 }
 0xce8   :  { %1353 = vadd.xlane.f32.xlu0 %v1352_v49 }
 0xce9   :  { %v1349_v51 = vsel %vm82_vm0, %v1347_v50, 0.0 }
 0xcea   :  { %1350 = vadd.xlane.f32.xlu1 %v1349_v51 }
 0xd71   :  { %v1354_v56 = vpop.xlane.xlu0 %1353 }
 0xd72   :  { %v1356_v57 = vmul.f32 0.03125, %v1354_v56 }
 0xd73   :  { %v1351_v58 = vpop.xlane.xlu1 %1350 }
 0xd74   :  { %v1358_v5 = vadd.f32 1e-05, %v1356_v57  ;;  %v1355_v62 = vmul.f32 0.03125, %v1351_v58 }
 0xd76   :  { %3240 = vrsqrt.f32 %v1358_v5  ;;  %v1357_v63 = vadd.f32 1e-05, %v1355_v62 }
 0xd78   :  { %3242 = vrsqrt.f32 %v1357_v63 }
 0xd83   :  { %v3241_v0 = vpop.eup %3240 }
 0xd84   :  { %v1362_v3 = vmul.f32 %v3241_v0, %v1346_v45 }
 0xd85   :  { %v3243_v4 = vpop.eup %3242 }
 0xd86   :  { %v1361_v6 = vmul.f32 %v3243_v4, %v1345_v47  ;;  %v1368_v7 = vmul.f32 %v2789_v1, %v1362_v3 }
 0xd88   :  { %v1367_v11 = vmul.f32 %v2789_v1, %v1361_v6  ;;  %v3661_v12 = vadd.f32 %v2790_v9, %v1368_v7 }
 0xd8a   :  { %v3659_v8 = vadd.f32 %v2790_v9, %v1367_v11 }
 0xd8c   :  { %3087 = vmatprep.mubr.msk.f32.mxu1 %vm82_vm0, %v3659_v8 }
 0xd8d   :  { %3088 = vmatmul.mubr.msk.f32.vlgmr.msra.gmra.mxu1 %vm82_vm0, %v3661_v12 }
 0xe4d   :  { %v3089_v14 = vpop.f32.mrf.mxu1 }
 0xe4e   :  { %v3670_v15 = vadd.f32 %v3089_v14, %v2795_v13 }
 0xe4f   :  { %v1457_v16 = vpop.f32.mrf.mxu1 }
 0xe50   :  { %v3672_v17 = vadd.f32 %v2795_v13, %v1457_v16  ;;  %1470 = vrot.lane.b32.xlu1 %v3670_v15, %s3311_s0 }
 0xe52   :  { %1468 = vrot.lane.b32.xlu0 %v3672_v17, %s3311_s0  ;;  %3094 = vmatprep.mubr.msk.f32.mxu1 %vm170_vm1, %v3672_v17 }
 0xe54   :  { %1674 = vrot.lane.b32.xlu1 %v3670_v15, %s3310_s15 }
 0xe56   :  { %1668 = vrot.lane.b32.xlu0 %v3672_v17, %s3312_s16 }
 0xe58   :  { %1672 = vrot.lane.b32.xlu1 %v3672_v17, %s3310_s15 }
 0xe5c   :  { %1670 = vrot.lane.b32.xlu1 %v3670_v15, %s3312_s16 }
 0xec2   :  { %v1471_v18 = vpop.permute.xlu1 %1470 }
 0xec3   :  { %3090 = vmatprep.subr.msk.mxu1 %vm170_vm1, %v1471_v18 }
 0xec4   :  { %3091 = vmatpush3.xpose.msk.msra.mxu1 %vm170_vm1, %v1471_v18  ;;  %v1469_v19 = vpop.permute.xlu0 %1468 }
 0xec5   :  { %3092 = vmatprep.subr.msk.mxu1 %vm170_vm1, %v1469_v19 }
 0xec6   :  { %v1675_v20 = vpop.permute.xlu1 %1674 }
 0xec8   :  { %3093 = vmatpush3.xpose.msk.msra.mxu1 %vm170_vm1, %v1469_v19  ;;  %v1669_v21 = vpop.permute.xlu0 %1668 }
 0xec9   :  { %3104 = vmatprep.subr.msk.mxu1 %vm170_vm1, %v1675_v20 }
 0xeca   :  { %v1673_v22 = vpop.permute.xlu1 %1672 }
 0xecb   :  { %3095 = vmatmul.mubr.msk.f32.vlgmr.msra.gmra.mxu1 %vm170_vm1, %v3670_v15 }
 0xecc   :  { %3105 = vmatpush3.xpose.msk.msra.mxu1 %vm170_vm1, %v1675_v20  ;;  %3108 = vmatprep.mubr.msk.f32.mxu1 %vm170_vm1, %v1669_v21 }
 0xecd   :  { %3106 = vmatprep.subr.msk.mxu1 %vm170_vm1, %v1673_v22 }
 0xece   :  { %v1671_v23 = vpop.permute.xlu1 %1670 }
 0xed0   :  { %3107 = vmatpush3.xpose.msk.msra.mxu1 %vm170_vm1, %v1673_v22 }
 0xed3   :  { %3109 = vmatmul.mubr.msk.f32.vlgmr.msra.gmra.mxu1 %vm170_vm1, %v1671_v23 }
 0xf8b   :  { %v3096_v24 = vpop.f32.mrf.mxu1 }
 0xf8c   :  { %v1552_v26 = vadd.f32 %v3096_v24, %v3426_v25 }
 0xf8d   :  { %v1546_v28 = vpop.f32.mrf.mxu1 }
 0xf8e   :  { %v1547_v29 = vadd.f32 %v1546_v28, %v3428_v27  ;;  %v1558_v10 = vsel %vm254_vm4, %v1552_v26, -inf }
 0xf8f   :  { %1559 = vmax.xlane.f32.xlu1 %v1558_v10 }
 0xf90   :  { %v1555_v30 = vsel %vm254_vm4, %v1547_v29, -inf }
 0xf91   :  { %1556 = vmax.xlane.f32.xlu0 %v1555_v30 }
 0xf93   :  { %v3110_v31 = vpop.f32.mrf.mxu1 }
 0xf94   :  { %v1756_v34 = vadd.f32 %v3110_v31, %v3426_v25 }
 0xf95   :  { %v1750_v32 = vpop.f32.mrf.mxu1 }
 0xf96   :  { %v1751_v33 = vadd.f32 %v1750_v32, %v3428_v27  ;;  %v1762_v36 = vsel %vm254_vm4, %v1756_v34, -inf }
 0xf98   :  { %v1759_v35 = vsel %vm254_vm4, %v1751_v33, -inf }
 0xf99   :  { %1760 = vmax.xlane.f32.xlu0 %v1759_v35 }
 0xf9d   :  { %1763 = vmax.xlane.f32.xlu0 %v1762_v36 }
 0xfa0   :  { %1581 = vrot.lane.b32.xlu1 %v3670_v15, %s3314_s17 }
 0xfa4   :  { %1785 = vrot.lane.b32.xlu1 %v3670_v15, %s3315_s18 }
 0xfa8   :  { %1783 = vrot.lane.b32.xlu1 %v3672_v17, %s3315_s18 }
 0xfb3   :  { %1579 = vrot.lane.b32.xlu0 %v3672_v17, %s3314_s17 }
0x1018   :  { %v1560_v37 = vpop.xlane.xlu1 %1559 }
0x1019   :  { %v1562_v38 = vsub.f32 %v1552_v26, %v1560_v37 }
0x101a   :  { %v1557_v39 = vpop.xlane.xlu0 %1556 }
0x101b   :  { %v1565_v40 = vmul.f32 1.442695, %v1562_v38  ;;  %v1561_v41 = vsub.f32 %v1547_v29, %v1557_v39 }
0x101c   :  { %v1582_v42 = vpop.permute.xlu1 %1581 }
0x101d   :  { %3244 = vpow2.f32 %v1565_v40  ;;  %v1563_v43 = vmul.f32 1.442695, %v1561_v41  ;;  %3097 = vmatprep.subr.mxu0 %v1582_v42 }
0x101e   :  { %3098 = vmatpush3.msra.mxu0 %v1582_v42 }
0x101f   :  { %3246 = vpow2.f32 %v1563_v43 }
0x1020   :  { %v1786_v52 = vpop.permute.xlu1 %1785 }
0x1022   :  { %v1761_v44 = vpop.xlane.xlu0 %1760 }
0x1023   :  { %v1765_v56 = vsub.f32 %v1751_v33, %v1761_v44 }
0x1024   :  { %v1784_v62 = vpop.permute.xlu1 %1783 }
0x1025   :  { %v1767_v57 = vmul.f32 1.442695, %v1765_v56 }
0x1026   :  { %v1764_v45 = vpop.xlane.xlu0 %1763 }
0x1027   :  { %v1766_v46 = vsub.f32 %v1756_v34, %v1764_v45 }
0x1029   :  { %v1769_v47 = vmul.f32 1.442695, %v1766_v46 }
0x102a   :  { %v3245_v48 = vpop.eup %3244  ;;  %v1580_v49 = vpop.permute.xlu0 %1579 }
0x102b   :  { %3248 = vpow2.f32 %v1769_v47  ;;  %3099 = vmatprep.subr.mxu0 %v1580_v49  ;;  %v1570_v50 = vsel %vm254_vm4, %v3245_v48, 0.0 }
0x102c   :  { %v3247_v51 = vpop.eup %3246  ;;  %1571 = vadd.xlane.f32.xlu0 %v1570_v50  ;;  %3100 = vmatpush3.msra.mxu0 %v1580_v49  ;;  %3250 = vpow2.f32 %v1767_v57 }
0x102d   :  { %3111 = vmatprep.subr.mxu0 %v1786_v52  ;;  %v1567_v53 = vsel %vm254_vm4, %v3247_v51, 0.0 }
0x102e   :  { %1568 = vadd.xlane.f32.xlu1 %v1567_v53 }
0x1038   :  { %v3249_v54 = vpop.eup %3248 }
0x1039   :  { %v1774_v55 = vsel %vm254_vm4, %v3249_v54, 0.0  ;;  %v3251_v58 = vpop.eup %3250 }
0x103a   :  { %1775 = vadd.xlane.f32.xlu0 %v1774_v55  ;;  %v1771_v5 = vsel %vm254_vm4, %v3251_v58, 0.0 }
0x103f   :  { %1884 = vrot.lane.b32.xlu1 %v3672_v17, %s3316_s19 }
0x1050   :  { %1886 = vrot.lane.b32.xlu0 %v3670_v15, %s3316_s19 }
0x1054   :  { %1880 = vrot.lane.b32.xlu0 %v3672_v17, %s3317_s20 }
0x1063   :  { %1772 = vadd.xlane.f32.xlu1 %v1771_v5 }
0x1074   :  { %1882 = vrot.lane.b32.xlu1 %v3670_v15, %s3317_s20 }
0x10b5   :  { %v1572_v63 = vpop.xlane.xlu0 %1571 }
0x10b6   :  { %3252 = vrcp.f32 %v1572_v63 }
0x10b7   :  { %v1569_v0 = vpop.xlane.xlu1 %1568 }
0x10b8   :  { %3254 = vrcp.f32 %v1569_v0 }
0x10bb   :  { %v1885_v16 = vpop.permute.xlu1 %1884 }
0x10c3   :  { %v1776_v1 = vpop.xlane.xlu0 %1775  ;;  %v3253_v3 = vpop.eup %3252 }
0x10c4   :  { %3256 = vrcp.f32 %v1776_v1  ;;  %v1576_v7 = vmul.f32 %v3253_v3, %v3245_v48 }
0x10c5   :  { %v3255_v4 = vpop.eup %3254 }
0x10c6   :  { %v1575_v6 = vmul.f32 %v3255_v4, %v3247_v51 }
0x10c7   :  { %v1887_v9 = vpop.permute.xlu0 %1886 }
0x10c8   :  { %3101 = vmatprep.mubr.msk.f32.mxu0 %vm254_vm4, %v1575_v6 }
0x10c9   :  { %3102 = vmatmul.mubr.msk.f32.vlgmr.msra.gmra.mxu0 %vm254_vm4, %v1576_v7 }
0x10ca   :  { %3112 = vmatpush3.msra.mxu0 %v1786_v52 }
0x10cb   :  { %3113 = vmatprep.subr.mxu0 %v1784_v62  ;;  %v1881_v22 = vpop.permute.xlu0 %1880 }
0x10cc   :  { %3114 = vmatpush3.msra.mxu0 %v1784_v62 }
0x10cd   :  { %3118 = vmatprep.subr.msk.mxu0 %vm170_vm1, %v1887_v9 }
0x10d1   :  { %v3257_v11 = vpop.eup %3256 }
0x10d2   :  { %v1780_v13 = vmul.f32 %v3257_v11, %v3249_v54 }
0x10d4   :  { %v3731_v14 = vadd.f32 %v1780_v13, %v1576_v7 }
0x10ec   :  { %v1773_v18 = vpop.xlane.xlu1 %1772 }
0x10ed   :  { %3258 = vrcp.f32 %v1773_v18 }
0x10f0   :  { %v1883_v23 = vpop.permute.xlu1 %1882 }
0x10fa   :  { %v3259_v19 = vpop.eup %3258 }
0x10fb   :  { %v1779_v20 = vmul.f32 %v3259_v19, %v3251_v58 }
0x10fd   :  { %v1781_v21 = vadd.f32 %v1779_v20, %v1575_v6  ;;  %3115 = vmatprep.mubr.msk.f32.mxu0 %vm254_vm4, %v1779_v20 }
0x10fe   :  { %3116 = vmatmul.mubr.msk.f32.vlgmr.msra.gmra.mxu0 %vm254_vm4, %v1780_v13 }
0x10ff   :  { %3119 = vmatpush3.xpose.msk.msra.mxu0 %vm170_vm1, %v1887_v9  ;;  %3122 = vmatprep.mubr.msk.f32.mxu0 %vm170_vm1, %v1881_v22 }
0x1100   :  { %3120 = vmatprep.subr.msk.mxu0 %vm170_vm1, %v1885_v16 }
0x1103   :  { %3121 = vmatpush3.xpose.msk.msra.mxu0 %vm170_vm1, %v1885_v16 }
0x1106   :  { %3123 = vmatmul.mubr.msk.f32.vlgmr.msra.gmra.mxu0 %vm170_vm1, %v1883_v23 }
0x1189   :  { %v3103_v24 = vpop.f32.mrf.mxu0 }
0x118a   :  { %1667 = vst.msk [vmem:[#allocation2 + $0x8] sm:$0xff] %vm170_vm1, %v3103_v24 }
0x118b   :  { %v1657_v26 = vpop.f32.mrf.mxu0 }
0x118c   :  { %1666 = vst.msk [vmem:[#allocation2] sm:$0xff] %vm170_vm1, %v1657_v26 }
0x11be   :  { %v3742_v28 = vpop.f32.mrf.mxu0 }
0x11c0   :  { %v3744_v29 = vpop.f32.mrf.mxu0 }
0x11c6   :  { %v3124_v10 = vpop.f32.mrf.mxu0 }
0x11c7   :  { %v1968_v30 = vadd.f32 %v3124_v10, %v3426_v25 }
0x11c8   :  { %v1962_v31 = vpop.f32.mrf.mxu0 }
0x11c9   :  { %v1963_v32 = vadd.f32 %v1962_v31, %v3428_v27  ;;  %v1974_v33 = vsel %vm254_vm4, %v1968_v30, -inf }
0x11ca   :  { %1975 = vmax.xlane.f32.xlu1 %v1974_v33 }
0x11cb   :  { %v1971_v34 = vsel %vm254_vm4, %v1963_v32, -inf }
0x11cc   :  { %1972 = vmax.xlane.f32.xlu0 %v1971_v34 }
0x11db   :  { %1997 = vrot.lane.b32.xlu1 %v3670_v15, %s3318_s21 }
0x11df   :  { %2098 = vrot.lane.b32.xlu1 %v3670_v15, %s3319_s22 }
0x11e3   :  { %2096 = vrot.lane.b32.xlu1 %v3672_v17, %s3319_s22 }
0x11e7   :  { %2094 = vrot.lane.b32.xlu1 %v3670_v15, %s3320_s23 }
0x1253   :  { %v1976_v35 = vpop.xlane.xlu1 %1975 }
0x1254   :  { %v1978_v36 = vsub.f32 %v1968_v30, %v1976_v35  ;;  %v2827_v35 = vld [vmem:[%s3912_s2 + $0x38] sm:$0xff] }
0x1255   :  { %v1973_v37 = vpop.xlane.xlu0 %1972 }
0x1256   :  { %v1981_v38 = vmul.f32 1.442695, %v1978_v36  ;;  %v1977_v39 = vsub.f32 %v1963_v32, %v1973_v37  ;;  %v2826_v36 = vld [vmem:[%s3912_s2 + $0x30] sm:$0xff]  ;;  %v2825_v37 = vld [vmem:[%s3912_s2 + $0x28] sm:$0xff] }
0x1257   :  { %v1998_v40 = vpop.permute.xlu1 %1997 }
0x1258   :  { %3260 = vpow2.f32 %v1981_v38  ;;  %v1979_v41 = vmul.f32 1.442695, %v1977_v39  ;;  %3125 = vmatprep.subr.mxu1 %v1998_v40  ;;  %v2824_v38 = vld [vmem:[%s3912_s2 + $0x20] sm:$0xff] }
0x1259   :  { %3126 = vmatpush3.msra.mxu1 %v1998_v40 }
0x125a   :  { %3262 = vpow2.f32 %v1979_v41 }
0x125b   :  { %v2099_v49 = vpop.permute.xlu1 %2098 }
0x125f   :  { %v2097_v57 = vpop.permute.xlu1 %2096 }
0x1263   :  { %v2095_v58 = vpop.permute.xlu1 %2094 }
0x1265   :  { %v3261_v42 = vpop.eup %3260 }
0x1266   :  { %v1986_v43 = vsel %vm254_vm4, %v3261_v42, 0.0 }
0x1267   :  { %v3263_v44 = vpop.eup %3262  ;;  %1987 = vadd.xlane.f32.xlu0 %v1986_v43 }
0x1268   :  { %v1983_v45 = vsel %vm254_vm4, %v3263_v44, 0.0 }
0x126b   :  { %1984 = vadd.xlane.f32.xlu0 %v1983_v45  ;;  %v2828_v45 = vld [vmem:[%s3915_s5 + $0x9] ss:$0 sm:$0xff] }
0x1281   :  { %1995 = vrot.lane.b32.xlu0 %v3672_v17, %s3318_s21 }
0x1285   :  { %2092 = vrot.lane.b32.xlu0 %v3672_v17, %s3320_s23 }
0x12f0   :  { %v1988_v46 = vpop.xlane.xlu0 %1987 }
0x12f1   :  { %3264 = vrcp.f32 %v1988_v46 }
0x12f4   :  { %v1985_v47 = vpop.xlane.xlu0 %1984 }
0x12f5   :  { %3266 = vrcp.f32 %v1985_v47 }
0x12f8   :  { %v1996_v48 = vpop.permute.xlu0 %1995 }
0x12f9   :  { %3127 = vmatprep.subr.mxu1 %v1996_v48 }
0x12fa   :  { %3128 = vmatpush3.msra.mxu1 %v1996_v48 }
0x12fb   :  { %3132 = vmatprep.subr.msk.mxu1 %vm170_vm1, %v2099_v49 }
0x12fc   :  { %v2093_v56 = vpop.permute.xlu0 %2092 }
0x12fe   :  { %v3265_v50 = vpop.eup %3264 }
0x12ff   :  { %v1992_v51 = vmul.f32 %v3265_v50, %v3261_v42 }
0x1301   :  { %v3766_v52 = vadd.f32 %v1992_v51, %v3731_v14 }
0x1302   :  { %v3267_v53 = vpop.eup %3266 }
0x1303   :  { %v1991_v54 = vmul.f32 %v3267_v53, %v3263_v44 }
0x1305   :  { %v3768_v55 = vadd.f32 %v1991_v54, %v1781_v21  ;;  %3129 = vmatprep.mubr.msk.f32.mxu1 %vm254_vm4, %v1991_v54 }
0x1306   :  { %3130 = vmatmul.mubr.msk.f32.vlgmr.msra.gmra.mxu1 %vm254_vm4, %v1992_v51 }
0x1307   :  { %3133 = vmatpush3.xpose.msk.msra.mxu1 %vm170_vm1, %v2099_v49  ;;  %3136 = vmatprep.mubr.msk.f32.mxu1 %vm170_vm1, %v2093_v56 }
0x1308   :  { %3134 = vmatprep.subr.msk.mxu1 %vm170_vm1, %v2097_v57 }
0x130b   :  { %3135 = vmatpush3.xpose.msk.msra.mxu1 %vm170_vm1, %v2097_v57 }
0x130e   :  { %3137 = vmatmul.mubr.msk.f32.vlgmr.msra.gmra.mxu1 %vm170_vm1, %v2095_v58 }
0x13c6   :  { %v3131_v5 = vpop.f32.mrf.mxu1 }
0x13c8   :  { %v2073_v62 = vpop.f32.mrf.mxu1 }
0x13ce   :  { %v3138_v63 = vpop.f32.mrf.mxu1 }
0x13cf   :  { %v2180_v0 = vadd.f32 %v3138_v63, %v3426_v25 }
0x13d0   :  { %v2174_v1 = vpop.f32.mrf.mxu1 }
0x13d1   :  { %v2175_v3 = vadd.f32 %v2174_v1, %v3428_v27  ;;  %v2186_v4 = vsel %vm254_vm4, %v2180_v0, -inf }
0x13d2   :  { %2187 = vmax.xlane.f32.xlu1 %v2186_v4 }
0x13d3   :  { %v2183_v6 = vsel %vm254_vm4, %v2175_v3, -inf }
0x13d4   :  { %2184 = vmax.xlane.f32.xlu0 %v2183_v6 }
0x13e3   :  { %2209 = vrot.lane.b32.xlu1 %v3670_v15, %s3321_s24 }
0x13e7   :  { %1872 = vrot.lane.b32.xlu1 %v3744_v29, %s3322_s25 }
0x13eb   :  { %1874 = vrot.lane.b32.xlu1 %v3742_v28, %s3322_s25 }
0x13ef   :  { %2086 = vrot.lane.b32.xlu1 %v3131_v5, %s3323_s26 }
0x145b   :  { %v2188_v25 = vpop.xlane.xlu1 %2187 }
0x145c   :  { %v2190_v7 = vsub.f32 %v2180_v0, %v2188_v25  ;;  %v2841_v0 = vld [vmem:[%s3914_s4 + $0x68] sm:$0xff] }
0x145d   :  { %v2185_v27 = vpop.xlane.xlu0 %2184 }
0x145e   :  { %v2193_v9 = vmul.f32 1.442695, %v2190_v7  ;;  %v2189_v11 = vsub.f32 %v2175_v3, %v2185_v27 }
0x145f   :  { %v2210_v13 = vpop.permute.xlu1 %2209 }
0x1460   :  { %3268 = vpow2.f32 %v2193_v9  ;;  %v2191_v14 = vmul.f32 1.442695, %v2189_v11  ;;  %3139 = vmatprep.subr.mxu0 %v2210_v13 }
0x1461   :  { %3140 = vmatpush3.msra.mxu0 %v2210_v13 }
0x1462   :  { %3270 = vpow2.f32 %v2191_v14 }
0x1463   :  { %v1873_v15 = vpop.permute.xlu1 %1872 }
0x1464   :  { %1878 = vst.msk [vmem:[#allocation2] sm:$0xff] %vm578_vm5, %v1873_v15  ;;  %v2831_v15 = vld [vmem:[%s3915_s5 + $0xa] ss:$0 sm:$0xff] }
0x1467   :  { %v1875_v16 = vpop.permute.xlu1 %1874 }
0x1468   :  { %1879 = vst.msk [vmem:[#allocation2 + $0x8] sm:$0xff] %vm578_vm5, %v1875_v16 }
0x146b   :  { %v2087_v18 = vpop.permute.xlu1 %2086 }
0x146c   :  { %2091 = vst.msk [vmem:[#allocation2 + $0x8] sm:$0xff] %vm791_vm6, %v2087_v18 }
0x146d   :  { %v3269_v19 = vpop.eup %3268 }
0x146e   :  { %v2198_v20 = vsel %vm254_vm4, %v3269_v19, 0.0 }
0x146f   :  { %v3271_v21 = vpop.eup %3270  ;;  %2199 = vadd.xlane.f32.xlu0 %v2198_v20  ;;  %v2832_v20 = vld [vmem:[%s3915_s5 + $0xb] ss:$0 sm:$0xff] }
0x1470   :  { %v2195_v22 = vsel %vm254_vm4, %v3271_v21, 0.0 }
0x1473   :  { %2196 = vadd.xlane.f32.xlu0 %v2195_v22 }
0x1489   :  { %2207 = vrot.lane.b32.xlu0 %v3672_v17, %s3321_s24 }
0x148d   :  { %2084 = vrot.lane.b32.xlu0 %v2073_v62, %s3323_s26 }
0x14f8   :  { %v2200_v23 = vpop.xlane.xlu0 %2199 }
0x14f9   :  { %3272 = vrcp.f32 %v2200_v23 }
0x14fc   :  { %v2197_v24 = vpop.xlane.xlu0 %2196 }
0x14fd   :  { %3274 = vrcp.f32 %v2197_v24  ;;  %v2839_v24 = vld [vmem:[%s3914_s4 + $0x58] sm:$0xff] }
0x1500   :  { %v2208_v26 = vpop.permute.xlu0 %2207 }
0x1501   :  { %3141 = vmatprep.subr.mxu0 %v2208_v26 }
0x1502   :  { %3142 = vmatpush3.msra.mxu0 %v2208_v26  ;;  %v2838_v26 = vld [vmem:[%s3914_s4 + $0x50] sm:$0xff] }
0x1503   :  { %3146 = vmatprep.subr.mxu0 %v2827_v35 }
0x1504   :  { %v2085_v28 = vpop.permute.xlu0 %2084 }
0x1505   :  { %2090 = vst.msk [vmem:[#allocation2] sm:$0xff] %vm791_vm6, %v2085_v28  ;;  %v2837_v28 = vld [vmem:[%s3914_s4 + $0x48] sm:$0xff] }
0x1506   :  { %v3273_v29 = vpop.eup %3272 }
0x1507   :  { %v2204_v10 = vmul.f32 %v3273_v29, %v3269_v19  ;;  %v2836_v29 = vld [vmem:[%s3914_s4 + $0x40] sm:$0xff] }
0x1509   :  { %v2206_v30 = vadd.f32 %v2204_v10, %v3766_v52 }
0x150a   :  { %v3275_v31 = vpop.eup %3274 }
0x150b   :  { %v2203_v32 = vmul.f32 %v3275_v31, %v3271_v21  ;;  %v2305_v33 = vmul.f32 0.25, %v2206_v30 }
0x150d   :  { %v2205_v17 = vadd.f32 %v2203_v32, %v3768_v55  ;;  %3143 = vmatprep.mubr.msk.f32.mxu0 %vm254_vm4, %v2203_v32  ;;  %2823 = vst.msk [vmem:[%s3917_s7 + $0x18] sm:$0xff] %vm254_vm4, %v2305_v33 }
0x150e   :  { %3144 = vmatmul.mubr.msk.f32.vlgmr.msra.gmra.mxu0 %vm254_vm4, %v2204_v10  ;;  %v2833_v10 = vld [vmem:[%s3915_s5 + $0xc] ss:$0 sm:$0xff] }
0x150f   :  { %v2304_v34 = vmul.f32 0.25, %v2205_v17  ;;  %3147 = vmatpush3.msra.mxu0 %v2827_v35  ;;  %v2844_v35 = vld [vmem:[%s3915_s5 + $0xd] ss:$0 sm:$0xff] }
0x1510   :  { %3148 = vmatprep.subr.mxu0 %v2826_v36 }
0x1511   :  { %2822 = vst.msk [vmem:[%s3917_s7 + $0x10] sm:$0xff] %vm254_vm4, %v2304_v34  ;;  %3149 = vmatpush3.msra.mxu0 %v2826_v36 }
0x1512   :  { %3150 = vmatprep.subr.mxu0 %v2825_v37 }
0x1513   :  { %3151 = vmatpush3.msra.mxu0 %v2825_v37 }
0x1514   :  { %3152 = vmatprep.subr.mxu0 %v2824_v38 }
0x1515   :  { %3153 = vmatpush3.msra.mxu0 %v2824_v38 }
0x15ce   :  { %v3145_v39 = vpop.f32.mrf.mxu0 }
0x15cf   :  { %2298 = vrot.lane.b32.xlu1 %v3145_v39, %s3324_s28 }
0x15d0   :  { %v2285_v40 = vpop.f32.mrf.mxu0 }
0x15d1   :  { %2296 = vrot.lane.b32.xlu0 %v2285_v40, %s3324_s28 }
0x1641   :  { %v2299_v41 = vpop.permute.xlu1 %2298 }
0x1642   :  { %2303 = vst.msk [vmem:[#allocation2 + $0x8] sm:$0xff] %vm1004_vm7, %v2299_v41 }
0x1643   :  { %v2297_v42 = vpop.permute.xlu0 %2296 }
0x1644   :  { %2302 = vst.msk [vmem:[#allocation2] sm:$0xff] %vm1004_vm7, %v2297_v42 }
0x1649   :  { %v2310_v44 = vld [vmem:[#allocation2 + $0x8] sm:$0xff] }
0x164b   :  { %v2309_v43 = vld [vmem:[#allocation2] sm:$0xff] }
0x164c   :  { %3154 = vmatprep.mubr.msk.f32.mxu0 %vm82_vm0, %v2309_v43 }
0x164d   :  { %3155 = vmatmul.mubr.msk.f32.vlgmr.msra.gmra.mxu0 %vm82_vm0, %v2310_v44 }
0x170d   :  { %v3156_v46 = vpop.f32.mrf.mxu0 }
0x170e   :  { %v2399_v47 = vadd.f32 %v3156_v46, %v2828_v45 }
0x170f   :  { %v2393_v48 = vpop.f32.mrf.mxu0 }
0x1710   :  { %v2394_v49 = vadd.f32 %v2828_v45, %v2393_v48  ;;  %v2403_v50 = vadd.f32 %v2399_v47, %v3661_v12 }
0x1712   :  { %v2409_v51 = vsel %vm82_vm0, %v2403_v50, 0.0  ;;  %v2402_v52 = vadd.f32 %v2394_v49, %v3659_v8 }
0x1713   :  { %2410 = vadd.xlane.f32.xlu1 %v2409_v51 }
0x1714   :  { %v2406_v53 = vsel %vm82_vm0, %v2402_v52, 0.0 }
0x1715   :  { %2407 = vadd.xlane.f32.xlu0 %v2406_v53 }
0x1724   :  { %2463 = vrot.lane.b32.xlu1 %v3572_v2, %s3314_s17 }
0x1728   :  { %2459 = vrot.lane.b32.xlu1 %v3584_v60, %s3314_s17  ;;  %v2843_v60 = vld [vmem:[%s3914_s4 + $0x78] sm:$0xff] }
0x1729   :  { %3168 = vmatprep.subr.mxu0 %v2843_v60 }
0x172a   :  { %3169 = vmatpush3.msra.mxu0 %v2843_v60 }
0x172c   :  { %2457 = vrot.lane.b32.xlu1 %v3593_v61, %s3314_s17  ;;  %v2842_v61 = vld [vmem:[%s3914_s4 + $0x70] sm:$0xff] }
0x172d   :  { %3170 = vmatprep.subr.mxu0 %v2842_v61 }
0x172e   :  { %3171 = vmatpush3.msra.mxu0 %v2842_v61 }
0x172f   :  { %3172 = vmatprep.subr.mxu0 %v2841_v0 }
0x1730   :  { %3173 = vmatpush3.msra.mxu0 %v2841_v0 }
0x179c   :  { %v2411_v54 = vpop.xlane.xlu1 %2410 }
0x179d   :  { %v2413_v55 = vmul.f32 0.03125, %v2411_v54 }
0x179e   :  { %v2408_v12 = vpop.xlane.xlu0 %2407 }
0x179f   :  { %v2415_v56 = vsub.f32 %v2403_v50, %v2413_v55  ;;  %v2412_v57 = vmul.f32 0.03125, %v2408_v12 }
0x17a0   :  { %v2464_v2 = vpop.permute.xlu1 %2463 }
0x17a1   :  { %v2414_v58 = vsub.f32 %v2402_v52, %v2412_v57  ;;  %v2417_v8 = vmul.f32 %v2415_v56, %v2415_v56  ;;  %3157 = vmatprep.subr.mxu1 %v2464_v2 }
0x17a2   :  { %3158 = vmatpush3.msra.mxu1 %v2464_v2 }
0x17a3   :  { %v2421_v5 = vsel %vm82_vm0, %v2417_v8, 0.0  ;;  %v2416_v62 = vmul.f32 %v2414_v58, %v2414_v58 }
0x17a4   :  { %2422 = vadd.xlane.f32.xlu0 %v2421_v5  ;;  %v2460_v25 = vpop.permute.xlu1 %2459  ;;  %v2847_v5 = vld [vmem:[%s3915_s5 + $0xe] ss:$0 sm:$0xff] }
0x17a5   :  { %v2418_v63 = vsel %vm82_vm0, %v2416_v62, 0.0 }
0x17a8   :  { %2419 = vadd.xlane.f32.xlu0 %v2418_v63  ;;  %v2458_v11 = vpop.permute.xlu1 %2457  ;;  %v2848_v63 = vld [vmem:[%s3915_s5 + $0xf] ss:$0 sm:$0xff] }
0x17be   :  { %2461 = vrot.lane.b32.xlu0 %v3577_v59, %s3314_s17  ;;  %v2840_v59 = vld [vmem:[%s3914_s4 + $0x60] sm:$0xff] }
0x17bf   :  { %3174 = vmatprep.subr.mxu0 %v2840_v59 }
0x17c0   :  { %3175 = vmatpush3.msra.mxu0 %v2840_v59 }
0x17c1   :  { %3176 = vmatprep.subr.mxu0 %v2839_v24 }
0x17c2   :  { %3177 = vmatpush3.msra.mxu0 %v2839_v24 }
0x17c3   :  { %3178 = vmatprep.subr.mxu0 %v2838_v26 }
0x17c4   :  { %3179 = vmatpush3.msra.mxu0 %v2838_v26  ;;  %v2849_v26 = vld [vmem:[%s3915_s5 + $0x10] ss:$0 sm:$0xff] }
0x17c5   :  { %3180 = vmatprep.subr.mxu0 %v2837_v28 }
0x17c6   :  { %3181 = vmatpush3.msra.mxu0 %v2837_v28 }
0x17c7   :  { %3182 = vmatprep.subr.mxu0 %v2836_v29 }
0x17c8   :  { %3183 = vmatpush3.msra.mxu0 %v2836_v29  ;;  %v2850_v29 = vld [vmem:[%s3915_s5 + $0x11] ss:$0 sm:$0xff] }
0x182d   :  { %v2423_v1 = vpop.xlane.xlu0 %2422 }
0x182e   :  { %v2425_v3 = vmul.f32 0.03125, %v2423_v1 }
0x1830   :  { %v2427_v4 = vadd.f32 1e-05, %v2425_v3 }
0x1831   :  { %v2420_v6 = vpop.xlane.xlu0 %2419 }
0x1832   :  { %3276 = vrsqrt.f32 %v2427_v4  ;;  %v2424_v7 = vmul.f32 0.03125, %v2420_v6 }
0x1834   :  { %v2426_v27 = vadd.f32 1e-05, %v2424_v7 }
0x1835   :  { %v2462_v9 = vpop.permute.xlu0 %2461 }
0x1836   :  { %3278 = vrsqrt.f32 %v2426_v27  ;;  %3159 = vmatprep.subr.mxu1 %v2462_v9 }
0x1837   :  { %3160 = vmatpush3.msra.mxu1 %v2462_v9 }
0x1838   :  { %3161 = vmatprep.subr.mxu1 %v2460_v25 }
0x1839   :  { %3162 = vmatpush3.msra.mxu1 %v2460_v25 }
0x183a   :  { %3163 = vmatprep.subr.mxu1 %v2458_v11 }
0x183b   :  { %3164 = vmatpush3.msra.mxu1 %v2458_v11 }
0x183f   :  { %v3277_v13 = vpop.eup %3276 }
0x1840   :  { %v2431_v14 = vmul.f32 %v3277_v13, %v2415_v56 }
0x1842   :  { %v2437_v19 = vmul.f32 %v2831_v15, %v2431_v14 }
0x1843   :  { %v3279_v16 = vpop.eup %3278 }
0x1844   :  { %v2430_v18 = vmul.f32 %v3279_v16, %v2414_v58  ;;  %v2443_v23 = vadd.f32 %v2832_v20, %v2437_v19 }
0x1846   :  { %v2436_v21 = vmul.f32 %v2831_v15, %v2430_v18 }
0x1848   :  { %v2442_v22 = vadd.f32 %v2832_v20, %v2436_v21 }
0x184a   :  { %3165 = vmatprep.mubr.msk.f32.mxu1 %vm82_vm0, %v2442_v22 }
0x184b   :  { %3166 = vmatmul.mubr.msk.f32.vlgmr.msra.gmra.mxu1 %vm82_vm0, %v2443_v23 }
0x190b   :  { %v3167_v30 = vpop.f32.mrf.mxu1 }
0x190c   :  { %v2547_v31 = vadd.f32 %v3167_v30, %v2833_v10 }
0x190d   :  { %v2541_v32 = vpop.f32.mrf.mxu1 }
0x190e   :  { %v2542_v33 = vadd.f32 %v2833_v10, %v2541_v32  ;;  %v2551_v34 = vmax.f32 %v2547_v31, 0.0 }
0x1910   :  { %v2550_v17 = vmax.f32 %v2542_v33, 0.0 }
0x1912   :  { %3184 = vmatprep.mubr.msk.f32.mxu0 %vm1251_vm8, %v2550_v17 }
0x1913   :  { %3185 = vmatmul.mubr.msk.f32.vlgmr.msra.gmra.mxu0 %vm1251_vm8, %v2551_v34 }
0x19d3   :  { %v3186_v36 = vpop.f32.mrf.mxu0 }
0x19d4   :  { %v2644_v37 = vadd.f32 %v3186_v36, %v2844_v35 }
0x19d5   :  { %v2638_v38 = vpop.f32.mrf.mxu0 }
0x19d6   :  { %v2648_v39 = vadd.f32 %v2644_v37, %v2443_v23  ;;  %v2639_v40 = vadd.f32 %v2844_v35, %v2638_v38 }
0x19d8   :  { %v2647_v41 = vadd.f32 %v2639_v40, %v2442_v22  ;;  %v2654_v42 = vsel %vm82_vm0, %v2648_v39, 0.0 }
0x19d9   :  { %2655 = vadd.xlane.f32.xlu1 %v2654_v42 }
0x19da   :  { %v2651_v43 = vsel %vm82_vm0, %v2647_v41, 0.0 }
0x19db   :  { %2652 = vadd.xlane.f32.xlu0 %v2651_v43 }
0x1a62   :  { %v2656_v44 = vpop.xlane.xlu1 %2655 }
0x1a63   :  { %v2658_v45 = vmul.f32 0.03125, %v2656_v44 }
0x1a64   :  { %v2653_v46 = vpop.xlane.xlu0 %2652 }
0x1a65   :  { %v2657_v47 = vmul.f32 0.03125, %v2653_v46  ;;  %v2660_v48 = vsub.f32 %v2648_v39, %v2658_v45 }
0x1a67   :  { %v2659_v49 = vsub.f32 %v2647_v41, %v2657_v47  ;;  %v2662_v52 = vmul.f32 %v2660_v48, %v2660_v48 }
0x1a69   :  { %v2661_v50 = vmul.f32 %v2659_v49, %v2659_v49  ;;  %v2666_v53 = vsel %vm82_vm0, %v2662_v52, 0.0 }
0x1a6b   :  { %v2663_v51 = vsel %vm82_vm0, %v2661_v50, 0.0 }
0x1a6c   :  { %2664 = vadd.xlane.f32.xlu0 %v2663_v51 }
0x1a70   :  { %2667 = vadd.xlane.f32.xlu0 %v2666_v53 }
0x1af5   :  { %v2665_v54 = vpop.xlane.xlu0 %2664 }
0x1af6   :  { %v2669_v55 = vmul.f32 0.03125, %v2665_v54 }
0x1af8   :  { %v2671_v12 = vadd.f32 1e-05, %v2669_v55 }
0x1af9   :  { %v2668_v56 = vpop.xlane.xlu0 %2667 }
0x1afa   :  { %3280 = vrsqrt.f32 %v2671_v12  ;;  %v2670_v57 = vmul.f32 0.03125, %v2668_v56 }
0x1afc   :  { %v2672_v58 = vadd.f32 1e-05, %v2670_v57 }
0x1afe   :  { %3282 = vrsqrt.f32 %v2672_v58 }
0x1b07   :  { %v3281_v8 = vpop.eup %3280 }
0x1b08   :  { %v2675_v62 = vmul.f32 %v3281_v8, %v2659_v49 }
0x1b0a   :  { %v2681_v2 = vmul.f32 %v2847_v5, %v2675_v62 }
0x1b0b   :  { %v3283_v60 = vpop.eup %3282 }
0x1b0c   :  { %v2687_v61 = vadd.f32 %v2848_v63, %v2681_v2  ;;  %v2676_v0 = vmul.f32 %v3283_v60, %v2660_v48 }
0x1b0e   :  { %v2691_v59 = vsel %vm82_vm0, %v2687_v61, 0.0  ;;  %v2682_v1 = vmul.f32 %v2847_v5, %v2676_v0 }
0x1b0f   :  { %2692 = vadd.xlane.f32.xlu1 %v2691_v59 }
0x1b10   :  { %v2688_v3 = vadd.f32 %v2848_v63, %v2682_v1 }
0x1b12   :  { %v2694_v4 = vsel %vm82_vm0, %v2688_v3, 0.0 }
0x1b13   :  { %2695 = vadd.xlane.f32.xlu0 %v2694_v4 }
0x1b98   :  { %v2693_v6 = vpop.xlane.xlu1 %2692 }
0x1b99   :  { %v2697_v25 = vmul.f32 0.03125, %v2693_v6 }
0x1b9b   :  { %v2699_v7 = vsub.f32 %v2687_v61, %v2697_v25 }
0x1b9c   :  { %v2696_v27 = vpop.xlane.xlu0 %2695 }
0x1b9d   :  { %v2698_v9 = vmul.f32 0.03125, %v2696_v27  ;;  %v2701_v11 = vmul.f32 %v2699_v7, %v2699_v7 }
0x1b9f   :  { %v2700_v13 = vsub.f32 %v2688_v3, %v2698_v9  ;;  %v2703_v14 = vsel %vm82_vm0, %v2701_v11, 0.0 }
0x1ba0   :  { %2704 = vadd.xlane.f32.xlu1 %v2703_v14 }
0x1ba1   :  { %v2702_v15 = vmul.f32 %v2700_v13, %v2700_v13 }
0x1ba3   :  { %v2706_v16 = vsel %vm82_vm0, %v2702_v15, 0.0 }
0x1ba4   :  { %2707 = vadd.xlane.f32.xlu0 %v2706_v16 }
0x1c29   :  { %v2705_v18 = vpop.xlane.xlu1 %2704 }
0x1c2a   :  { %v2709_v19 = vmul.f32 0.03125, %v2705_v18 }
0x1c2c   :  { %v2711_v20 = vadd.f32 1e-05, %v2709_v19 }
0x1c2d   :  { %v2708_v21 = vpop.xlane.xlu0 %2707 }
0x1c2e   :  { %3284 = vrsqrt.f32 %v2711_v20  ;;  %v2710_v22 = vmul.f32 0.03125, %v2708_v21 }
0x1c30   :  { %v2712_v23 = vadd.f32 1e-05, %v2710_v22 }
0x1c32   :  { %3286 = vrsqrt.f32 %v2712_v23 }
0x1c3b   :  { %v3285_v24 = vpop.eup %3284 }
0x1c3c   :  { %v2715_v28 = vmul.f32 %v3285_v24, %v2699_v7 }
0x1c3e   :  { %v2721_v10 = vmul.f32 %v2849_v26, %v2715_v28 }
0x1c3f   :  { %v3287_v30 = vpop.eup %3286 }
0x1c40   :  { %v2716_v31 = vmul.f32 %v3287_v30, %v2700_v13  ;;  %v2727_v32 = vadd.f32 %v2850_v29, %v2721_v10 }
0x1c42   :  { %v2722_v33 = vmul.f32 %v2849_v26, %v2716_v31  ;;  %2729 = vst.msk [vmem:[#allocation3] sm:$0xff] %vm82_vm0, %v2727_v32 }
0x1c44   :  { %v2728_v17 = vadd.f32 %v2850_v29, %v2722_v33 }
0x1c46   :  { %2730 = vst.msk [vmem:[#allocation3 + $0x8] sm:$0xff] %vm82_vm0, %v2728_v17 }
0x1c47   :  { %3299 = shalt.err (!%p3296_p4)
}
0x1c48   :  { %s3326_s5 = smov 128  }
0x1c49   :  { %2742 = dma.vmem_to_hbm [thread:$0]  %s2737_s14, 256, %s3916_s6, [#allocation4], %s3326_s5, %s3326_s5, %s3322_s25  }
0x1c4a   :  { %3308 = dma.done.wait [#allocation4], 256  }
0x1c4b   :  { %3309 = vsyncadd [#allocation4], 4294967040 }
0x1c4c   :  { %2750 = vsyncpa [#allocation4], 1 }

</bundles_post_ra>
